<compile_context>
chip_gen: v6e
topology: v6e:2x2x1
jax: 0.10.0
libtpu: 0.0.40
codegen_flags: <defaults>
</compile_context>

<pallas_src>
import math

import jax
import jax.numpy as jnp
from jax.experimental import pallas as pl
from jax.experimental.pallas import tpu as pltpu

# ---------------- config (small, self-contained) ----------------
VOCAB = 100
VOCAB_PAD = 128          # lane-dense padded vocab (ids never reach the pad rows)
HIDDEN = 32
NUM_HEADS = 4
HEAD_DIM = HIDDEN // NUM_HEADS
FFN = 64
NUM_LAYERS = 2
MAX_POS = 16
LABEL_SIZE = 5
LABEL_PAD = 128          # lane-dense padded classifier width
BATCH = 2
SEQ = 8
LN_EPS = 1e-12
NEG_BIG = -1e9           # bias for padded label columns / cross-batch attention


# ---------------- the single fused kernel ----------------
def _bert_fused_kernel(
    ids_ref, bias_ref,
    word_emb_ref, pos_type_ref, emb_g_ref, emb_b_ref,
    qkv_w_ref, qkv_b_ref, o_w_ref, o_b_ref, ln1_g_ref, ln1_b_ref,
    ff1_w_ref, ff1_b_ref, ff2_w_ref, ff2_b_ref, ln2_g_ref, ln2_b_ref,
    cls_w_ref, cls_b_ref,
    out_ref,
    ctx_ref,                    # VMEM scratch (B*S, H) for attention context
):
    BS = BATCH * SEQ

    def layer_norm(x, g, b):
        mu = jnp.mean(x, axis=-1, keepdims=True)
        xc = x - mu
        var = jnp.mean(xc * xc, axis=-1, keepdims=True)
        return xc * jax.lax.rsqrt(var + LN_EPS) * g + b

    # ---- embeddings: gather-as-one-hot-matmul, fully in VMEM ----
    ids = ids_ref[...]                                           # (BS, 1) int32
    tok_onehot = (jax.lax.broadcasted_iota(jnp.int32, (BS, VOCAB_PAD), 1)
                  == ids).astype(jnp.float32)
    tok = jnp.dot(tok_onehot, word_emb_ref[...],
                  preferred_element_type=jnp.float32)            # (BS, H)

    # position + token-type(=0) embeddings pre-folded into one tensor.
    x = layer_norm(tok + pos_type_ref[...], emb_g_ref[...], emb_b_ref[...])

    bias = bias_ref[...]                                         # (BS, BS) additive
    scale = 1.0 / math.sqrt(HEAD_DIM)
    gelu_c = math.sqrt(2.0 / math.pi)

    # ---- encoder layers, unrolled, all weights resident in VMEM ----
    for l in range(NUM_LAYERS):
        # fused QKV projection: one (H, 3H) matmul instead of three
        qkv = (jnp.dot(x, qkv_w_ref[l], preferred_element_type=jnp.float32)
               + qkv_b_ref[l])                                   # (BS, 3H)
        q = qkv[:, 0 * HIDDEN:1 * HIDDEN]
        k = qkv[:, 1 * HIDDEN:2 * HIDDEN]
        v = qkv[:, 2 * HIDDEN:3 * HIDDEN]

        # self-attention: all batches at once per head via block-diag bias
        for h in range(NUM_HEADS):
            c0, c1 = h * HEAD_DIM, (h + 1) * HEAD_DIM
            qh = q[:, c0:c1]
            kh = k[:, c0:c1]
            vh = v[:, c0:c1]
            s = (jnp.dot(qh, kh.T, preferred_element_type=jnp.float32)
                 * scale + bias)                                 # (BS, BS)
            s = s - jnp.max(s, axis=-1, keepdims=True)
            p = jnp.exp(s)
            p = p * pl.reciprocal(jnp.sum(p, axis=-1, keepdims=True),
                                  approx=True)
            ctx_ref[:, c0:c1] = jnp.dot(p, vh,
                                        preferred_element_type=jnp.float32)

        ctx = ctx_ref[...]                                       # (BS, H)
        attn_out = (jnp.dot(ctx, o_w_ref[l], preferred_element_type=jnp.float32)
                    + o_b_ref[l])
        x = layer_norm(x + attn_out, ln1_g_ref[l], ln1_b_ref[l])   # fused residual+LN

        h1 = (jnp.dot(x, ff1_w_ref[l], preferred_element_type=jnp.float32)
              + ff1_b_ref[l])
        # TODO(synk): HF BERT uses exact erf-GELU; tanh approximation used here.
        h1 = 0.5 * h1 * (1.0 + jnp.tanh(gelu_c * (h1 + 0.044715 * h1 * h1 * h1)))
        h2 = (jnp.dot(h1, ff2_w_ref[l], preferred_element_type=jnp.float32)
              + ff2_b_ref[l])
        x = layer_norm(x + h2, ln2_g_ref[l], ln2_b_ref[l])         # fused residual+LN

    # ---- classifier head + log_softmax, lane-dense (padded to 128) ----
    logits = (jnp.dot(x, cls_w_ref[...], preferred_element_type=jnp.float32)
              + cls_b_ref[...])                                  # (BS, LABEL_PAD)
    z = logits - jnp.max(logits, axis=-1, keepdims=True)
    lse = jnp.log(jnp.sum(jnp.exp(z), axis=-1, keepdims=True))
    out_ref[...] = z - lse


def bert_forward_fused(p, ids_col, bias_full):
    BS = BATCH * SEQ
    n_inputs = 20
    vmem_spec = pl.BlockSpec(memory_space=pltpu.MemorySpace.VMEM)
    return pl.pallas_call(
        _bert_fused_kernel,
        out_shape=jax.ShapeDtypeStruct((BS, LABEL_PAD), jnp.float32),
        in_specs=[vmem_spec] * n_inputs,
        out_specs=vmem_spec,
        scratch_shapes=[pltpu.VMEM((BS, HIDDEN), jnp.float32)],
    )(
        ids_col, bias_full,
        p["word_emb"], p["pos_type"], p["emb_ln_g"], p["emb_ln_b"],
        p["qkv_w"], p["qkv_b"], p["o_w"], p["o_b"], p["ln1_g"], p["ln1_b"],
        p["ff1_w"], p["ff1_b"], p["ff2_w"], p["ff2_b"], p["ln2_g"], p["ln2_b"],
        p["cls_w"], p["cls_b"],
    )


# ---------------- parameters (deterministic synthetic init, pre-stacked) ----------------
def init_params(key):
    def normal(k, shape):
        return 0.02 * jax.random.normal(k, shape, dtype=jnp.float32)

    keys = jax.random.split(key, 10)
    L, H = NUM_LAYERS, HIDDEN

    # lane-dense padded vocab table (rows >= VOCAB are never selected)
    word_emb = jnp.zeros((VOCAB_PAD, H), jnp.float32)
    word_emb = word_emb.at[:VOCAB, :].set(normal(keys[0], (VOCAB, H)))

    # position + token-type(=0) embeddings, pre-folded for (BATCH, SEQ)
    pos_emb = normal(keys[1], (MAX_POS, H))
    type_emb = normal(keys[2], (1, H))
    pos_type = jnp.tile(pos_emb[:SEQ, :], (BATCH, 1)) + type_emb     # (B*S, H)

    # lane-dense padded classifier head
    cls_w = normal(keys[3], (H, LABEL_SIZE))
    cls_w_pad = jnp.zeros((H, LABEL_PAD), jnp.float32).at[:, :LABEL_SIZE].set(cls_w)
    cls_b_pad = jnp.full((1, LABEL_PAD), NEG_BIG, jnp.float32).at[:, :LABEL_SIZE].set(0.0)

    params = {
        "word_emb": word_emb,
        "pos_type": pos_type,
        "emb_ln_g": jnp.ones((1, H), jnp.float32),
        "emb_ln_b": jnp.zeros((1, H), jnp.float32),
        # stacked per-layer weights (layer axis first)
        "qkv_w": normal(keys[4], (L, H, 3 * H)),
        "qkv_b": jnp.zeros((L, 1, 3 * H), jnp.float32),
        "o_w": normal(keys[5], (L, H, H)),
        "o_b": jnp.zeros((L, 1, H), jnp.float32),
        "ln1_g": jnp.ones((L, 1, H), jnp.float32),
        "ln1_b": jnp.zeros((L, 1, H), jnp.float32),
        "ff1_w": normal(keys[6], (L, H, FFN)),
        "ff1_b": jnp.zeros((L, 1, FFN), jnp.float32),
        "ff2_w": normal(keys[7], (L, FFN, H)),
        "ff2_b": jnp.zeros((L, 1, H), jnp.float32),
        "ln2_g": jnp.ones((L, 1, H), jnp.float32),
        "ln2_b": jnp.zeros((L, 1, H), jnp.float32),
        "cls_w": cls_w_pad,
        "cls_b": cls_b_pad,
    }
    return params


# ---------------- forward (matches PyTorch module semantics) ----------------
def bert_for_punctuator(params, sentences):
    B, S = sentences.shape
    assert S <= MAX_POS, "sequence length exceeds position-embedding table"

    # attention_mask = torch.sign(sentences) -> additive key bias (HF-style),
    # plus a block-diagonal term so batches cannot attend across each other.
    attention_mask = jnp.sign(sentences).astype(jnp.float32)          # (B, S)
    key_bias = (1.0 - attention_mask) * -10000.0                      # (B, S)
    batch_id = jnp.arange(B * S, dtype=jnp.int32) // S
    same_batch = batch_id[:, None] == batch_id[None, :]               # (BS, BS)
    bias_full = jnp.where(same_batch, key_bias.reshape(-1)[None, :],
                          NEG_BIG).astype(jnp.float32)                # (BS, BS)

    ids_col = sentences.reshape(B * S, 1).astype(jnp.int32)           # (B*S, 1)

    # Entire BERT encoder + Linear + log_softmax in ONE fused Pallas kernel.
    logprobs_pad = bert_forward_fused(params, ids_col, bias_full)     # (B*S, 128)
    return logprobs_pad[:, :LABEL_SIZE].reshape(B, S, LABEL_SIZE)


if __name__ == "__main__":
    key = jax.random.PRNGKey(0)
    pkey, dkey = jax.random.split(key)
    params = init_params(pkey)

    # Deterministic token ids; trailing zeros exercise the attention mask path.
    sentences = jax.random.randint(dkey, (BATCH, SEQ), 1, VOCAB, dtype=jnp.int32)
    sentences = sentences.at[1, -2:].set(0)

    out = jax.jit(bert_for_punctuator)(params, sentences)
    out = jax.block_until_ready(out)

    assert out.shape == (BATCH, SEQ, LABEL_SIZE)
    assert bool(jnp.all(jnp.isfinite(out)))
    # log_softmax rows must sum (in prob space) to 1.
    assert bool(jnp.allclose(jnp.sum(jnp.exp(out), axis=-1), 1.0, atol=1e-4))
    print("KERNEL_OK")
</pallas_src>

<mosaic_0001>
module attributes {stable_mosaic.version = 11 : i64} {
  func.func @_bert_fused_kernel(%arg0: memref<16x1xi32, #tpu.memory_space<vmem>>, %arg1: memref<16x16xf32, #tpu.memory_space<vmem>>, %arg2: memref<128x32xf32, #tpu.memory_space<vmem>>, %arg3: memref<16x32xf32, #tpu.memory_space<vmem>>, %arg4: memref<1x32xf32, #tpu.memory_space<vmem>>, %arg5: memref<1x32xf32, #tpu.memory_space<vmem>>, %arg6: memref<2x32x96xf32, #tpu.memory_space<vmem>>, %arg7: memref<2x1x96xf32, #tpu.memory_space<vmem>>, %arg8: memref<2x32x32xf32, #tpu.memory_space<vmem>>, %arg9: memref<2x1x32xf32, #tpu.memory_space<vmem>>, %arg10: memref<2x1x32xf32, #tpu.memory_space<vmem>>, %arg11: memref<2x1x32xf32, #tpu.memory_space<vmem>>, %arg12: memref<2x32x64xf32, #tpu.memory_space<vmem>>, %arg13: memref<2x1x64xf32, #tpu.memory_space<vmem>>, %arg14: memref<2x64x32xf32, #tpu.memory_space<vmem>>, %arg15: memref<2x1x32xf32, #tpu.memory_space<vmem>>, %arg16: memref<2x1x32xf32, #tpu.memory_space<vmem>>, %arg17: memref<2x1x32xf32, #tpu.memory_space<vmem>>, %arg18: memref<32x128xf32, #tpu.memory_space<vmem>>, %arg19: memref<1x128xf32, #tpu.memory_space<vmem>>, %arg20: memref<16x128xf32, #tpu.memory_space<vmem>>, %arg21: memref<16x32xf32, #tpu.memory_space<vmem>>) attributes {dimension_semantics = [], scalar_prefetch = 0 : i64, scratch_operands = 1 : i64, tpu.core_type = #tpu.core_type<tc>} {
    %c0 = arith.constant 0 : index
    %c0_0 = arith.constant 0 : index
    %0 = vector.load %arg0[%c0, %c0_0] : memref<16x1xi32, #tpu.memory_space<vmem>>, vector<16x1xi32>
    %1 = tpu.iota {dimensions = array<i32: 1>} : vector<16x128xi32>
    %2 = vector.broadcast %0 : vector<16x1xi32> to vector<16x128xi32>
    %3 = arith.cmpi eq, %1, %2 : vector<16x128xi32>
    %4 = arith.extui %3 : vector<16x128xi1> to vector<16x128xi32>
    %5 = arith.sitofp %4 : vector<16x128xi32> to vector<16x128xf32>
    %c0_1 = arith.constant 0 : index
    %c0_2 = arith.constant 0 : index
    %6 = vector.load %arg2[%c0_1, %c0_2] : memref<128x32xf32, #tpu.memory_space<vmem>>, vector<128x32xf32>
    %cst = arith.constant dense<0.000000e+00> : vector<16x32xf32>
    %7 = tpu.matmul %5, %6, %cst {dimension_numbers = #tpu.dot_dimension_numbers<[1], [0], [0], [1], [0, 0, 1, 1], [], []>} : vector<16x128xf32>, vector<128x32xf32>, vector<16x32xf32> -> vector<16x32xf32>
    %c0_3 = arith.constant 0 : index
    %c0_4 = arith.constant 0 : index
    %8 = vector.load %arg3[%c0_3, %c0_4] : memref<16x32xf32, #tpu.memory_space<vmem>>, vector<16x32xf32>
    %9 = arith.addf %7, %8 : vector<16x32xf32>
    %c0_5 = arith.constant 0 : index
    %c0_6 = arith.constant 0 : index
    %10 = vector.load %arg4[%c0_5, %c0_6] : memref<1x32xf32, #tpu.memory_space<vmem>>, vector<1x32xf32>
    %c0_7 = arith.constant 0 : index
    %c0_8 = arith.constant 0 : index
    %11 = vector.load %arg5[%c0_7, %c0_8] : memref<1x32xf32, #tpu.memory_space<vmem>>, vector<1x32xf32>
    %cst_9 = arith.constant dense<0.000000e+00> : vector<16xf32>
    %12 = vector.multi_reduction <add>, %9, %cst_9 [1] : vector<16x32xf32> to vector<16xf32>
    %13 = vector.shape_cast %12 : vector<16xf32> to vector<16x1xf32>
    %cst_10 = arith.constant 3.200000e+01 : f32
    %14 = vector.broadcast %cst_10 : f32 to vector<16x1xf32>
    %15 = arith.divf %13, %14 : vector<16x1xf32>
    %16 = vector.broadcast %15 : vector<16x1xf32> to vector<16x32xf32>
    %17 = arith.subf %9, %16 : vector<16x32xf32>
    %18 = arith.mulf %17, %17 : vector<16x32xf32>
    %cst_11 = arith.constant dense<0.000000e+00> : vector<16xf32>
    %19 = vector.multi_reduction <add>, %18, %cst_11 [1] : vector<16x32xf32> to vector<16xf32>
    %20 = vector.shape_cast %19 : vector<16xf32> to vector<16x1xf32>
    %cst_12 = arith.constant 3.200000e+01 : f32
    %21 = vector.broadcast %cst_12 : f32 to vector<16x1xf32>
    %22 = arith.divf %20, %21 : vector<16x1xf32>
    %cst_13 = arith.constant 9.99999996E-13 : f32
    %23 = vector.broadcast %cst_13 : f32 to vector<16x1xf32>
    %24 = arith.addf %22, %23 : vector<16x1xf32>
    %25 = math.rsqrt %24 : vector<16x1xf32>
    %26 = vector.broadcast %25 : vector<16x1xf32> to vector<16x32xf32>
    %27 = arith.mulf %17, %26 : vector<16x32xf32>
    %28 = vector.broadcast %10 : vector<1x32xf32> to vector<16x32xf32>
    %29 = arith.mulf %27, %28 : vector<16x32xf32>
    %30 = vector.broadcast %11 : vector<1x32xf32> to vector<16x32xf32>
    %31 = arith.addf %29, %30 : vector<16x32xf32>
    %c0_14 = arith.constant 0 : index
    %c0_15 = arith.constant 0 : index
    %32 = vector.load %arg1[%c0_14, %c0_15] : memref<16x16xf32, #tpu.memory_space<vmem>>, vector<16x16xf32>
    %c0_16 = arith.constant 0 : index
    %c0_17 = arith.constant 0 : index
    %c0_18 = arith.constant 0 : index
    %33 = vector.load %arg6[%c0_16, %c0_17, %c0_18] : memref<2x32x96xf32, #tpu.memory_space<vmem>>, vector<1x32x96xf32>
    %34 = vector.shape_cast %33 : vector<1x32x96xf32> to vector<32x96xf32>
    %cst_19 = arith.constant dense<0.000000e+00> : vector<16x96xf32>
    %35 = tpu.matmul %31, %34, %cst_19 {dimension_numbers = #tpu.dot_dimension_numbers<[1], [0], [0], [1], [0, 0, 1, 1], [], []>} : vector<16x32xf32>, vector<32x96xf32>, vector<16x96xf32> -> vector<16x96xf32>
    %c0_20 = arith.constant 0 : index
    %c0_21 = arith.constant 0 : index
    %c0_22 = arith.constant 0 : index
    %36 = vector.load %arg7[%c0_20, %c0_21, %c0_22] : memref<2x1x96xf32, #tpu.memory_space<vmem>>, vector<1x1x96xf32>
    %37 = vector.shape_cast %36 : vector<1x1x96xf32> to vector<1x96xf32>
    %38 = vector.broadcast %37 : vector<1x96xf32> to vector<16x96xf32>
    %39 = arith.addf %35, %38 : vector<16x96xf32>
    %40 = vector.extract_strided_slice %39 {offsets = [0, 0], sizes = [16, 32], strides = [1, 1]} : vector<16x96xf32> to vector<16x32xf32>
    %41 = vector.extract_strided_slice %39 {offsets = [0, 32], sizes = [16, 32], strides = [1, 1]} : vector<16x96xf32> to vector<16x32xf32>
    %42 = vector.extract_strided_slice %39 {offsets = [0, 64], sizes = [16, 32], strides = [1, 1]} : vector<16x96xf32> to vector<16x32xf32>
    %43 = vector.extract_strided_slice %40 {offsets = [0, 0], sizes = [16, 8], strides = [1, 1]} : vector<16x32xf32> to vector<16x8xf32>
    %44 = vector.extract_strided_slice %41 {offsets = [0, 0], sizes = [16, 8], strides = [1, 1]} : vector<16x32xf32> to vector<16x8xf32>
    %45 = vector.extract_strided_slice %42 {offsets = [0, 0], sizes = [16, 8], strides = [1, 1]} : vector<16x32xf32> to vector<16x8xf32>
    %46 = tpu.transpose %44, [1, 0] : vector<16x8xf32> -> vector<8x16xf32>
    %cst_23 = arith.constant dense<0.000000e+00> : vector<16x16xf32>
    %47 = tpu.matmul %43, %46, %cst_23 {dimension_numbers = #tpu.dot_dimension_numbers<[1], [0], [0], [1], [0, 0, 1, 1], [], []>} : vector<16x8xf32>, vector<8x16xf32>, vector<16x16xf32> -> vector<16x16xf32>
    %cst_24 = arith.constant 0.353553385 : f32
    %48 = vector.broadcast %cst_24 : f32 to vector<16x16xf32>
    %49 = arith.mulf %47, %48 : vector<16x16xf32>
    %50 = arith.addf %49, %32 : vector<16x16xf32>
    %cst_25 = arith.constant dense<0xFF800000> : vector<16xf32>
    %51 = vector.multi_reduction <maximumf>, %50, %cst_25 [1] : vector<16x16xf32> to vector<16xf32>
    %52 = vector.shape_cast %51 : vector<16xf32> to vector<16x1xf32>
    %53 = vector.broadcast %52 : vector<16x1xf32> to vector<16x16xf32>
    %54 = arith.subf %50, %53 : vector<16x16xf32>
    %55 = math.exp %54 : vector<16x16xf32>
    %cst_26 = arith.constant dense<0.000000e+00> : vector<16xf32>
    %56 = vector.multi_reduction <add>, %55, %cst_26 [1] : vector<16x16xf32> to vector<16xf32>
    %57 = vector.shape_cast %56 : vector<16xf32> to vector<16x1xf32>
    %58 = tpu.reciprocal %57 {approx = true} : vector<16x1xf32> -> vector<16x1xf32>
    %59 = vector.broadcast %58 : vector<16x1xf32> to vector<16x16xf32>
    %60 = arith.mulf %55, %59 : vector<16x16xf32>
    %cst_27 = arith.constant dense<0.000000e+00> : vector<16x8xf32>
    %61 = tpu.matmul %60, %45, %cst_27 {dimension_numbers = #tpu.dot_dimension_numbers<[1], [0], [0], [1], [0, 0, 1, 1], [], []>} : vector<16x16xf32>, vector<16x8xf32>, vector<16x8xf32> -> vector<16x8xf32>
    %c0_28 = arith.constant 0 : index
    %c0_29 = arith.constant 0 : index
    %62 = vector.load %arg21[%c0_28, %c0_29] : memref<16x32xf32, #tpu.memory_space<vmem>>, vector<16x8xf32>
    tpu.vector_store %arg21[%c0_28, %c0_29], %61 {strides = array<i32>} : memref<16x32xf32, #tpu.memory_space<vmem>>, vector<16x8xf32>,
    %63 = vector.extract_strided_slice %40 {offsets = [0, 8], sizes = [16, 8], strides = [1, 1]} : vector<16x32xf32> to vector<16x8xf32>
    %64 = vector.extract_strided_slice %41 {offsets = [0, 8], sizes = [16, 8], strides = [1, 1]} : vector<16x32xf32> to vector<16x8xf32>
    %65 = vector.extract_strided_slice %42 {offsets = [0, 8], sizes = [16, 8], strides = [1, 1]} : vector<16x32xf32> to vector<16x8xf32>
    %66 = tpu.transpose %64, [1, 0] : vector<16x8xf32> -> vector<8x16xf32>
    %cst_30 = arith.constant dense<0.000000e+00> : vector<16x16xf32>
    %67 = tpu.matmul %63, %66, %cst_30 {dimension_numbers = #tpu.dot_dimension_numbers<[1], [0], [0], [1], [0, 0, 1, 1], [], []>} : vector<16x8xf32>, vector<8x16xf32>, vector<16x16xf32> -> vector<16x16xf32>
    %cst_31 = arith.constant 0.353553385 : f32
    %68 = vector.broadcast %cst_31 : f32 to vector<16x16xf32>
    %69 = arith.mulf %67, %68 : vector<16x16xf32>
    %70 = arith.addf %69, %32 : vector<16x16xf32>
    %cst_32 = arith.constant dense<0xFF800000> : vector<16xf32>
    %71 = vector.multi_reduction <maximumf>, %70, %cst_32 [1] : vector<16x16xf32> to vector<16xf32>
    %72 = vector.shape_cast %71 : vector<16xf32> to vector<16x1xf32>
    %73 = vector.broadcast %72 : vector<16x1xf32> to vector<16x16xf32>
    %74 = arith.subf %70, %73 : vector<16x16xf32>
    %75 = math.exp %74 : vector<16x16xf32>
    %cst_33 = arith.constant dense<0.000000e+00> : vector<16xf32>
    %76 = vector.multi_reduction <add>, %75, %cst_33 [1] : vector<16x16xf32> to vector<16xf32>
    %77 = vector.shape_cast %76 : vector<16xf32> to vector<16x1xf32>
    %78 = tpu.reciprocal %77 {approx = true} : vector<16x1xf32> -> vector<16x1xf32>
    %79 = vector.broadcast %78 : vector<16x1xf32> to vector<16x16xf32>
    %80 = arith.mulf %75, %79 : vector<16x16xf32>
    %cst_34 = arith.constant dense<0.000000e+00> : vector<16x8xf32>
    %81 = tpu.matmul %80, %65, %cst_34 {dimension_numbers = #tpu.dot_dimension_numbers<[1], [0], [0], [1], [0, 0, 1, 1], [], []>} : vector<16x16xf32>, vector<16x8xf32>, vector<16x8xf32> -> vector<16x8xf32>
    %c0_35 = arith.constant 0 : index
    %c8 = arith.constant 8 : index
    %82 = vector.load %arg21[%c0_35, %c8] : memref<16x32xf32, #tpu.memory_space<vmem>>, vector<16x8xf32>
    tpu.vector_store %arg21[%c0_35, %c8], %81 {strides = array<i32>} : memref<16x32xf32, #tpu.memory_space<vmem>>, vector<16x8xf32>,
    %83 = vector.extract_strided_slice %40 {offsets = [0, 16], sizes = [16, 8], strides = [1, 1]} : vector<16x32xf32> to vector<16x8xf32>
    %84 = vector.extract_strided_slice %41 {offsets = [0, 16], sizes = [16, 8], strides = [1, 1]} : vector<16x32xf32> to vector<16x8xf32>
    %85 = vector.extract_strided_slice %42 {offsets = [0, 16], sizes = [16, 8], strides = [1, 1]} : vector<16x32xf32> to vector<16x8xf32>
    %86 = tpu.transpose %84, [1, 0] : vector<16x8xf32> -> vector<8x16xf32>
    %cst_36 = arith.constant dense<0.000000e+00> : vector<16x16xf32>
    %87 = tpu.matmul %83, %86, %cst_36 {dimension_numbers = #tpu.dot_dimension_numbers<[1], [0], [0], [1], [0, 0, 1, 1], [], []>} : vector<16x8xf32>, vector<8x16xf32>, vector<16x16xf32> -> vector<16x16xf32>
    %cst_37 = arith.constant 0.353553385 : f32
    %88 = vector.broadcast %cst_37 : f32 to vector<16x16xf32>
    %89 = arith.mulf %87, %88 : vector<16x16xf32>
    %90 = arith.addf %89, %32 : vector<16x16xf32>
    %cst_38 = arith.constant dense<0xFF800000> : vector<16xf32>
    %91 = vector.multi_reduction <maximumf>, %90, %cst_38 [1] : vector<16x16xf32> to vector<16xf32>
    %92 = vector.shape_cast %91 : vector<16xf32> to vector<16x1xf32>
    %93 = vector.broadcast %92 : vector<16x1xf32> to vector<16x16xf32>
    %94 = arith.subf %90, %93 : vector<16x16xf32>
    %95 = math.exp %94 : vector<16x16xf32>
    %cst_39 = arith.constant dense<0.000000e+00> : vector<16xf32>
    %96 = vector.multi_reduction <add>, %95, %cst_39 [1] : vector<16x16xf32> to vector<16xf32>
    %97 = vector.shape_cast %96 : vector<16xf32> to vector<16x1xf32>
    %98 = tpu.reciprocal %97 {approx = true} : vector<16x1xf32> -> vector<16x1xf32>
    %99 = vector.broadcast %98 : vector<16x1xf32> to vector<16x16xf32>
    %100 = arith.mulf %95, %99 : vector<16x16xf32>
    %cst_40 = arith.constant dense<0.000000e+00> : vector<16x8xf32>
    %101 = tpu.matmul %100, %85, %cst_40 {dimension_numbers = #tpu.dot_dimension_numbers<[1], [0], [0], [1], [0, 0, 1, 1], [], []>} : vector<16x16xf32>, vector<16x8xf32>, vector<16x8xf32> -> vector<16x8xf32>
    %c0_41 = arith.constant 0 : index
    %c16 = arith.constant 16 : index
    %102 = vector.load %arg21[%c0_41, %c16] : memref<16x32xf32, #tpu.memory_space<vmem>>, vector<16x8xf32>
    tpu.vector_store %arg21[%c0_41, %c16], %101 {strides = array<i32>} : memref<16x32xf32, #tpu.memory_space<vmem>>, vector<16x8xf32>,
    %103 = vector.extract_strided_slice %40 {offsets = [0, 24], sizes = [16, 8], strides = [1, 1]} : vector<16x32xf32> to vector<16x8xf32>
    %104 = vector.extract_strided_slice %41 {offsets = [0, 24], sizes = [16, 8], strides = [1, 1]} : vector<16x32xf32> to vector<16x8xf32>
    %105 = vector.extract_strided_slice %42 {offsets = [0, 24], sizes = [16, 8], strides = [1, 1]} : vector<16x32xf32> to vector<16x8xf32>
    %106 = tpu.transpose %104, [1, 0] : vector<16x8xf32> -> vector<8x16xf32>
    %cst_42 = arith.constant dense<0.000000e+00> : vector<16x16xf32>
    %107 = tpu.matmul %103, %106, %cst_42 {dimension_numbers = #tpu.dot_dimension_numbers<[1], [0], [0], [1], [0, 0, 1, 1], [], []>} : vector<16x8xf32>, vector<8x16xf32>, vector<16x16xf32> -> vector<16x16xf32>
    %cst_43 = arith.constant 0.353553385 : f32
    %108 = vector.broadcast %cst_43 : f32 to vector<16x16xf32>
    %109 = arith.mulf %107, %108 : vector<16x16xf32>
    %110 = arith.addf %109, %32 : vector<16x16xf32>
    %cst_44 = arith.constant dense<0xFF800000> : vector<16xf32>
    %111 = vector.multi_reduction <maximumf>, %110, %cst_44 [1] : vector<16x16xf32> to vector<16xf32>
    %112 = vector.shape_cast %111 : vector<16xf32> to vector<16x1xf32>
    %113 = vector.broadcast %112 : vector<16x1xf32> to vector<16x16xf32>
    %114 = arith.subf %110, %113 : vector<16x16xf32>
    %115 = math.exp %114 : vector<16x16xf32>
    %cst_45 = arith.constant dense<0.000000e+00> : vector<16xf32>
    %116 = vector.multi_reduction <add>, %115, %cst_45 [1] : vector<16x16xf32> to vector<16xf32>
    %117 = vector.shape_cast %116 : vector<16xf32> to vector<16x1xf32>
    %118 = tpu.reciprocal %117 {approx = true} : vector<16x1xf32> -> vector<16x1xf32>
    %119 = vector.broadcast %118 : vector<16x1xf32> to vector<16x16xf32>
    %120 = arith.mulf %115, %119 : vector<16x16xf32>
    %cst_46 = arith.constant dense<0.000000e+00> : vector<16x8xf32>
    %121 = tpu.matmul %120, %105, %cst_46 {dimension_numbers = #tpu.dot_dimension_numbers<[1], [0], [0], [1], [0, 0, 1, 1], [], []>} : vector<16x16xf32>, vector<16x8xf32>, vector<16x8xf32> -> vector<16x8xf32>
    %c0_47 = arith.constant 0 : index
    %c24 = arith.constant 24 : index
    %122 = vector.load %arg21[%c0_47, %c24] : memref<16x32xf32, #tpu.memory_space<vmem>>, vector<16x8xf32>
    tpu.vector_store %arg21[%c0_47, %c24], %121 {strides = array<i32>} : memref<16x32xf32, #tpu.memory_space<vmem>>, vector<16x8xf32>,
    %c0_48 = arith.constant 0 : index
    %c0_49 = arith.constant 0 : index
    %123 = vector.load %arg21[%c0_48, %c0_49] : memref<16x32xf32, #tpu.memory_space<vmem>>, vector<16x32xf32>
    %c0_50 = arith.constant 0 : index
    %c0_51 = arith.constant 0 : index
    %c0_52 = arith.constant 0 : index
    %124 = vector.load %arg8[%c0_50, %c0_51, %c0_52] : memref<2x32x32xf32, #tpu.memory_space<vmem>>, vector<1x32x32xf32>
    %125 = vector.shape_cast %124 : vector<1x32x32xf32> to vector<32x32xf32>
    %cst_53 = arith.constant dense<0.000000e+00> : vector<16x32xf32>
    %126 = tpu.matmul %123, %125, %cst_53 {dimension_numbers = #tpu.dot_dimension_numbers<[1], [0], [0], [1], [0, 0, 1, 1], [], []>} : vector<16x32xf32>, vector<32x32xf32>, vector<16x32xf32> -> vector<16x32xf32>
    %c0_54 = arith.constant 0 : index
    %c0_55 = arith.constant 0 : index
    %c0_56 = arith.constant 0 : index
    %127 = vector.load %arg9[%c0_54, %c0_55, %c0_56] : memref<2x1x32xf32, #tpu.memory_space<vmem>>, vector<1x1x32xf32>
    %128 = vector.shape_cast %127 : vector<1x1x32xf32> to vector<1x32xf32>
    %129 = vector.broadcast %128 : vector<1x32xf32> to vector<16x32xf32>
    %130 = arith.addf %126, %129 : vector<16x32xf32>
    %131 = arith.addf %31, %130 : vector<16x32xf32>
    %c0_57 = arith.constant 0 : index
    %c0_58 = arith.constant 0 : index
    %c0_59 = arith.constant 0 : index
    %132 = vector.load %arg10[%c0_57, %c0_58, %c0_59] : memref<2x1x32xf32, #tpu.memory_space<vmem>>, vector<1x1x32xf32>
    %133 = vector.shape_cast %132 : vector<1x1x32xf32> to vector<1x32xf32>
    %c0_60 = arith.constant 0 : index
    %c0_61 = arith.constant 0 : index
    %c0_62 = arith.constant 0 : index
    %134 = vector.load %arg11[%c0_60, %c0_61, %c0_62] : memref<2x1x32xf32, #tpu.memory_space<vmem>>, vector<1x1x32xf32>
    %135 = vector.shape_cast %134 : vector<1x1x32xf32> to vector<1x32xf32>
    %cst_63 = arith.constant dense<0.000000e+00> : vector<16xf32>
    %136 = vector.multi_reduction <add>, %131, %cst_63 [1] : vector<16x32xf32> to vector<16xf32>
    %137 = vector.shape_cast %136 : vector<16xf32> to vector<16x1xf32>
    %cst_64 = arith.constant 3.200000e+01 : f32
    %138 = vector.broadcast %cst_64 : f32 to vector<16x1xf32>
    %139 = arith.divf %137, %138 : vector<16x1xf32>
    %140 = vector.broadcast %139 : vector<16x1xf32> to vector<16x32xf32>
    %141 = arith.subf %131, %140 : vector<16x32xf32>
    %142 = arith.mulf %141, %141 : vector<16x32xf32>
    %cst_65 = arith.constant dense<0.000000e+00> : vector<16xf32>
    %143 = vector.multi_reduction <add>, %142, %cst_65 [1] : vector<16x32xf32> to vector<16xf32>
    %144 = vector.shape_cast %143 : vector<16xf32> to vector<16x1xf32>
    %cst_66 = arith.constant 3.200000e+01 : f32
    %145 = vector.broadcast %cst_66 : f32 to vector<16x1xf32>
    %146 = arith.divf %144, %145 : vector<16x1xf32>
    %cst_67 = arith.constant 9.99999996E-13 : f32
    %147 = vector.broadcast %cst_67 : f32 to vector<16x1xf32>
    %148 = arith.addf %146, %147 : vector<16x1xf32>
    %149 = math.rsqrt %148 : vector<16x1xf32>
    %150 = vector.broadcast %149 : vector<16x1xf32> to vector<16x32xf32>
    %151 = arith.mulf %141, %150 : vector<16x32xf32>
    %152 = vector.broadcast %133 : vector<1x32xf32> to vector<16x32xf32>
    %153 = arith.mulf %151, %152 : vector<16x32xf32>
    %154 = vector.broadcast %135 : vector<1x32xf32> to vector<16x32xf32>
    %155 = arith.addf %153, %154 : vector<16x32xf32>
    %c0_68 = arith.constant 0 : index
    %c0_69 = arith.constant 0 : index
    %c0_70 = arith.constant 0 : index
    %156 = vector.load %arg12[%c0_68, %c0_69, %c0_70] : memref<2x32x64xf32, #tpu.memory_space<vmem>>, vector<1x32x64xf32>
    %157 = vector.shape_cast %156 : vector<1x32x64xf32> to vector<32x64xf32>
    %cst_71 = arith.constant dense<0.000000e+00> : vector<16x64xf32>
    %158 = tpu.matmul %155, %157, %cst_71 {dimension_numbers = #tpu.dot_dimension_numbers<[1], [0], [0], [1], [0, 0, 1, 1], [], []>} : vector<16x32xf32>, vector<32x64xf32>, vector<16x64xf32> -> vector<16x64xf32>
    %c0_72 = arith.constant 0 : index
    %c0_73 = arith.constant 0 : index
    %c0_74 = arith.constant 0 : index
    %159 = vector.load %arg13[%c0_72, %c0_73, %c0_74] : memref<2x1x64xf32, #tpu.memory_space<vmem>>, vector<1x1x64xf32>
    %160 = vector.shape_cast %159 : vector<1x1x64xf32> to vector<1x64xf32>
    %161 = vector.broadcast %160 : vector<1x64xf32> to vector<16x64xf32>
    %162 = arith.addf %158, %161 : vector<16x64xf32>
    %cst_75 = arith.constant 5.000000e-01 : f32
    %163 = vector.broadcast %cst_75 : f32 to vector<16x64xf32>
    %164 = arith.mulf %163, %162 : vector<16x64xf32>
    %cst_76 = arith.constant 4.471500e-02 : f32
    %165 = vector.broadcast %cst_76 : f32 to vector<16x64xf32>
    %166 = arith.mulf %165, %162 : vector<16x64xf32>
    %167 = arith.mulf %166, %162 : vector<16x64xf32>
    %168 = arith.mulf %167, %162 : vector<16x64xf32>
    %169 = arith.addf %162, %168 : vector<16x64xf32>
    %cst_77 = arith.constant 0.797884583 : f32
    %170 = vector.broadcast %cst_77 : f32 to vector<16x64xf32>
    %171 = arith.mulf %170, %169 : vector<16x64xf32>
    %172 = math.tanh %171 : vector<16x64xf32>
    %cst_78 = arith.constant 1.000000e+00 : f32
    %173 = vector.broadcast %cst_78 : f32 to vector<16x64xf32>
    %174 = arith.addf %173, %172 : vector<16x64xf32>
    %175 = arith.mulf %164, %174 : vector<16x64xf32>
    %c0_79 = arith.constant 0 : index
    %c0_80 = arith.constant 0 : index
    %c0_81 = arith.constant 0 : index
    %176 = vector.load %arg14[%c0_79, %c0_80, %c0_81] : memref<2x64x32xf32, #tpu.memory_space<vmem>>, vector<1x64x32xf32>
    %177 = vector.shape_cast %176 : vector<1x64x32xf32> to vector<64x32xf32>
    %cst_82 = arith.constant dense<0.000000e+00> : vector<16x32xf32>
    %178 = tpu.matmul %175, %177, %cst_82 {dimension_numbers = #tpu.dot_dimension_numbers<[1], [0], [0], [1], [0, 0, 1, 1], [], []>} : vector<16x64xf32>, vector<64x32xf32>, vector<16x32xf32> -> vector<16x32xf32>
    %c0_83 = arith.constant 0 : index
    %c0_84 = arith.constant 0 : index
    %c0_85 = arith.constant 0 : index
    %179 = vector.load %arg15[%c0_83, %c0_84, %c0_85] : memref<2x1x32xf32, #tpu.memory_space<vmem>>, vector<1x1x32xf32>
    %180 = vector.shape_cast %179 : vector<1x1x32xf32> to vector<1x32xf32>
    %181 = vector.broadcast %180 : vector<1x32xf32> to vector<16x32xf32>
    %182 = arith.addf %178, %181 : vector<16x32xf32>
    %183 = arith.addf %155, %182 : vector<16x32xf32>
    %c0_86 = arith.constant 0 : index
    %c0_87 = arith.constant 0 : index
    %c0_88 = arith.constant 0 : index
    %184 = vector.load %arg16[%c0_86, %c0_87, %c0_88] : memref<2x1x32xf32, #tpu.memory_space<vmem>>, vector<1x1x32xf32>
    %185 = vector.shape_cast %184 : vector<1x1x32xf32> to vector<1x32xf32>
    %c0_89 = arith.constant 0 : index
    %c0_90 = arith.constant 0 : index
    %c0_91 = arith.constant 0 : index
    %186 = vector.load %arg17[%c0_89, %c0_90, %c0_91] : memref<2x1x32xf32, #tpu.memory_space<vmem>>, vector<1x1x32xf32>
    %187 = vector.shape_cast %186 : vector<1x1x32xf32> to vector<1x32xf32>
    %cst_92 = arith.constant dense<0.000000e+00> : vector<16xf32>
    %188 = vector.multi_reduction <add>, %183, %cst_92 [1] : vector<16x32xf32> to vector<16xf32>
    %189 = vector.shape_cast %188 : vector<16xf32> to vector<16x1xf32>
    %cst_93 = arith.constant 3.200000e+01 : f32
    %190 = vector.broadcast %cst_93 : f32 to vector<16x1xf32>
    %191 = arith.divf %189, %190 : vector<16x1xf32>
    %192 = vector.broadcast %191 : vector<16x1xf32> to vector<16x32xf32>
    %193 = arith.subf %183, %192 : vector<16x32xf32>
    %194 = arith.mulf %193, %193 : vector<16x32xf32>
    %cst_94 = arith.constant dense<0.000000e+00> : vector<16xf32>
    %195 = vector.multi_reduction <add>, %194, %cst_94 [1] : vector<16x32xf32> to vector<16xf32>
    %196 = vector.shape_cast %195 : vector<16xf32> to vector<16x1xf32>
    %cst_95 = arith.constant 3.200000e+01 : f32
    %197 = vector.broadcast %cst_95 : f32 to vector<16x1xf32>
    %198 = arith.divf %196, %197 : vector<16x1xf32>
    %cst_96 = arith.constant 9.99999996E-13 : f32
    %199 = vector.broadcast %cst_96 : f32 to vector<16x1xf32>
    %200 = arith.addf %198, %199 : vector<16x1xf32>
    %201 = math.rsqrt %200 : vector<16x1xf32>
    %202 = vector.broadcast %201 : vector<16x1xf32> to vector<16x32xf32>
    %203 = arith.mulf %193, %202 : vector<16x32xf32>
    %204 = vector.broadcast %185 : vector<1x32xf32> to vector<16x32xf32>
    %205 = arith.mulf %203, %204 : vector<16x32xf32>
    %206 = vector.broadcast %187 : vector<1x32xf32> to vector<16x32xf32>
    %207 = arith.addf %205, %206 : vector<16x32xf32>
    %c1 = arith.constant 1 : index
    %c0_97 = arith.constant 0 : index
    %c0_98 = arith.constant 0 : index
    %208 = vector.load %arg6[%c1, %c0_97, %c0_98] : memref<2x32x96xf32, #tpu.memory_space<vmem>>, vector<1x32x96xf32>
    %209 = vector.shape_cast %208 : vector<1x32x96xf32> to vector<32x96xf32>
    %cst_99 = arith.constant dense<0.000000e+00> : vector<16x96xf32>
    %210 = tpu.matmul %207, %209, %cst_99 {dimension_numbers = #tpu.dot_dimension_numbers<[1], [0], [0], [1], [0, 0, 1, 1], [], []>} : vector<16x32xf32>, vector<32x96xf32>, vector<16x96xf32> -> vector<16x96xf32>
    %c1_100 = arith.constant 1 : index
    %c0_101 = arith.constant 0 : index
    %c0_102 = arith.constant 0 : index
    %211 = vector.load %arg7[%c1_100, %c0_101, %c0_102] : memref<2x1x96xf32, #tpu.memory_space<vmem>>, vector<1x1x96xf32>
    %212 = vector.shape_cast %211 : vector<1x1x96xf32> to vector<1x96xf32>
    %213 = vector.broadcast %212 : vector<1x96xf32> to vector<16x96xf32>
    %214 = arith.addf %210, %213 : vector<16x96xf32>
    %215 = vector.extract_strided_slice %214 {offsets = [0, 0], sizes = [16, 32], strides = [1, 1]} : vector<16x96xf32> to vector<16x32xf32>
    %216 = vector.extract_strided_slice %214 {offsets = [0, 32], sizes = [16, 32], strides = [1, 1]} : vector<16x96xf32> to vector<16x32xf32>
    %217 = vector.extract_strided_slice %214 {offsets = [0, 64], sizes = [16, 32], strides = [1, 1]} : vector<16x96xf32> to vector<16x32xf32>
    %218 = vector.extract_strided_slice %215 {offsets = [0, 0], sizes = [16, 8], strides = [1, 1]} : vector<16x32xf32> to vector<16x8xf32>
    %219 = vector.extract_strided_slice %216 {offsets = [0, 0], sizes = [16, 8], strides = [1, 1]} : vector<16x32xf32> to vector<16x8xf32>
    %220 = vector.extract_strided_slice %217 {offsets = [0, 0], sizes = [16, 8], strides = [1, 1]} : vector<16x32xf32> to vector<16x8xf32>
    %221 = tpu.transpose %219, [1, 0] : vector<16x8xf32> -> vector<8x16xf32>
    %cst_103 = arith.constant dense<0.000000e+00> : vector<16x16xf32>
    %222 = tpu.matmul %218, %221, %cst_103 {dimension_numbers = #tpu.dot_dimension_numbers<[1], [0], [0], [1], [0, 0, 1, 1], [], []>} : vector<16x8xf32>, vector<8x16xf32>, vector<16x16xf32> -> vector<16x16xf32>
    %cst_104 = arith.constant 0.353553385 : f32
    %223 = vector.broadcast %cst_104 : f32 to vector<16x16xf32>
    %224 = arith.mulf %222, %223 : vector<16x16xf32>
    %225 = arith.addf %224, %32 : vector<16x16xf32>
    %cst_105 = arith.constant dense<0xFF800000> : vector<16xf32>
    %226 = vector.multi_reduction <maximumf>, %225, %cst_105 [1] : vector<16x16xf32> to vector<16xf32>
    %227 = vector.shape_cast %226 : vector<16xf32> to vector<16x1xf32>
    %228 = vector.broadcast %227 : vector<16x1xf32> to vector<16x16xf32>
    %229 = arith.subf %225, %228 : vector<16x16xf32>
    %230 = math.exp %229 : vector<16x16xf32>
    %cst_106 = arith.constant dense<0.000000e+00> : vector<16xf32>
    %231 = vector.multi_reduction <add>, %230, %cst_106 [1] : vector<16x16xf32> to vector<16xf32>
    %232 = vector.shape_cast %231 : vector<16xf32> to vector<16x1xf32>
    %233 = tpu.reciprocal %232 {approx = true} : vector<16x1xf32> -> vector<16x1xf32>
    %234 = vector.broadcast %233 : vector<16x1xf32> to vector<16x16xf32>
    %235 = arith.mulf %230, %234 : vector<16x16xf32>
    %cst_107 = arith.constant dense<0.000000e+00> : vector<16x8xf32>
    %236 = tpu.matmul %235, %220, %cst_107 {dimension_numbers = #tpu.dot_dimension_numbers<[1], [0], [0], [1], [0, 0, 1, 1], [], []>} : vector<16x16xf32>, vector<16x8xf32>, vector<16x8xf32> -> vector<16x8xf32>
    %c0_108 = arith.constant 0 : index
    %c0_109 = arith.constant 0 : index
    %237 = vector.load %arg21[%c0_108, %c0_109] : memref<16x32xf32, #tpu.memory_space<vmem>>, vector<16x8xf32>
    tpu.vector_store %arg21[%c0_108, %c0_109], %236 {strides = array<i32>} : memref<16x32xf32, #tpu.memory_space<vmem>>, vector<16x8xf32>,
    %238 = vector.extract_strided_slice %215 {offsets = [0, 8], sizes = [16, 8], strides = [1, 1]} : vector<16x32xf32> to vector<16x8xf32>
    %239 = vector.extract_strided_slice %216 {offsets = [0, 8], sizes = [16, 8], strides = [1, 1]} : vector<16x32xf32> to vector<16x8xf32>
    %240 = vector.extract_strided_slice %217 {offsets = [0, 8], sizes = [16, 8], strides = [1, 1]} : vector<16x32xf32> to vector<16x8xf32>
    %241 = tpu.transpose %239, [1, 0] : vector<16x8xf32> -> vector<8x16xf32>
    %cst_110 = arith.constant dense<0.000000e+00> : vector<16x16xf32>
    %242 = tpu.matmul %238, %241, %cst_110 {dimension_numbers = #tpu.dot_dimension_numbers<[1], [0], [0], [1], [0, 0, 1, 1], [], []>} : vector<16x8xf32>, vector<8x16xf32>, vector<16x16xf32> -> vector<16x16xf32>
    %cst_111 = arith.constant 0.353553385 : f32
    %243 = vector.broadcast %cst_111 : f32 to vector<16x16xf32>
    %244 = arith.mulf %242, %243 : vector<16x16xf32>
    %245 = arith.addf %244, %32 : vector<16x16xf32>
    %cst_112 = arith.constant dense<0xFF800000> : vector<16xf32>
    %246 = vector.multi_reduction <maximumf>, %245, %cst_112 [1] : vector<16x16xf32> to vector<16xf32>
    %247 = vector.shape_cast %246 : vector<16xf32> to vector<16x1xf32>
    %248 = vector.broadcast %247 : vector<16x1xf32> to vector<16x16xf32>
    %249 = arith.subf %245, %248 : vector<16x16xf32>
    %250 = math.exp %249 : vector<16x16xf32>
    %cst_113 = arith.constant dense<0.000000e+00> : vector<16xf32>
    %251 = vector.multi_reduction <add>, %250, %cst_113 [1] : vector<16x16xf32> to vector<16xf32>
    %252 = vector.shape_cast %251 : vector<16xf32> to vector<16x1xf32>
    %253 = tpu.reciprocal %252 {approx = true} : vector<16x1xf32> -> vector<16x1xf32>
    %254 = vector.broadcast %253 : vector<16x1xf32> to vector<16x16xf32>
    %255 = arith.mulf %250, %254 : vector<16x16xf32>
    %cst_114 = arith.constant dense<0.000000e+00> : vector<16x8xf32>
    %256 = tpu.matmul %255, %240, %cst_114 {dimension_numbers = #tpu.dot_dimension_numbers<[1], [0], [0], [1], [0, 0, 1, 1], [], []>} : vector<16x16xf32>, vector<16x8xf32>, vector<16x8xf32> -> vector<16x8xf32>
    %c0_115 = arith.constant 0 : index
    %c8_116 = arith.constant 8 : index
    %257 = vector.load %arg21[%c0_115, %c8_116] : memref<16x32xf32, #tpu.memory_space<vmem>>, vector<16x8xf32>
    tpu.vector_store %arg21[%c0_115, %c8_116], %256 {strides = array<i32>} : memref<16x32xf32, #tpu.memory_space<vmem>>, vector<16x8xf32>,
    %258 = vector.extract_strided_slice %215 {offsets = [0, 16], sizes = [16, 8], strides = [1, 1]} : vector<16x32xf32> to vector<16x8xf32>
    %259 = vector.extract_strided_slice %216 {offsets = [0, 16], sizes = [16, 8], strides = [1, 1]} : vector<16x32xf32> to vector<16x8xf32>
    %260 = vector.extract_strided_slice %217 {offsets = [0, 16], sizes = [16, 8], strides = [1, 1]} : vector<16x32xf32> to vector<16x8xf32>
    %261 = tpu.transpose %259, [1, 0] : vector<16x8xf32> -> vector<8x16xf32>
    %cst_117 = arith.constant dense<0.000000e+00> : vector<16x16xf32>
    %262 = tpu.matmul %258, %261, %cst_117 {dimension_numbers = #tpu.dot_dimension_numbers<[1], [0], [0], [1], [0, 0, 1, 1], [], []>} : vector<16x8xf32>, vector<8x16xf32>, vector<16x16xf32> -> vector<16x16xf32>
    %cst_118 = arith.constant 0.353553385 : f32
    %263 = vector.broadcast %cst_118 : f32 to vector<16x16xf32>
    %264 = arith.mulf %262, %263 : vector<16x16xf32>
    %265 = arith.addf %264, %32 : vector<16x16xf32>
    %cst_119 = arith.constant dense<0xFF800000> : vector<16xf32>
    %266 = vector.multi_reduction <maximumf>, %265, %cst_119 [1] : vector<16x16xf32> to vector<16xf32>
    %267 = vector.shape_cast %266 : vector<16xf32> to vector<16x1xf32>
    %268 = vector.broadcast %267 : vector<16x1xf32> to vector<16x16xf32>
    %269 = arith.subf %265, %268 : vector<16x16xf32>
    %270 = math.exp %269 : vector<16x16xf32>
    %cst_120 = arith.constant dense<0.000000e+00> : vector<16xf32>
    %271 = vector.multi_reduction <add>, %270, %cst_120 [1] : vector<16x16xf32> to vector<16xf32>
    %272 = vector.shape_cast %271 : vector<16xf32> to vector<16x1xf32>
    %273 = tpu.reciprocal %272 {approx = true} : vector<16x1xf32> -> vector<16x1xf32>
    %274 = vector.broadcast %273 : vector<16x1xf32> to vector<16x16xf32>
    %275 = arith.mulf %270, %274 : vector<16x16xf32>
    %cst_121 = arith.constant dense<0.000000e+00> : vector<16x8xf32>
    %276 = tpu.matmul %275, %260, %cst_121 {dimension_numbers = #tpu.dot_dimension_numbers<[1], [0], [0], [1], [0, 0, 1, 1], [], []>} : vector<16x16xf32>, vector<16x8xf32>, vector<16x8xf32> -> vector<16x8xf32>
    %c0_122 = arith.constant 0 : index
    %c16_123 = arith.constant 16 : index
    %277 = vector.load %arg21[%c0_122, %c16_123] : memref<16x32xf32, #tpu.memory_space<vmem>>, vector<16x8xf32>
    tpu.vector_store %arg21[%c0_122, %c16_123], %276 {strides = array<i32>} : memref<16x32xf32, #tpu.memory_space<vmem>>, vector<16x8xf32>,
    %278 = vector.extract_strided_slice %215 {offsets = [0, 24], sizes = [16, 8], strides = [1, 1]} : vector<16x32xf32> to vector<16x8xf32>
    %279 = vector.extract_strided_slice %216 {offsets = [0, 24], sizes = [16, 8], strides = [1, 1]} : vector<16x32xf32> to vector<16x8xf32>
    %280 = vector.extract_strided_slice %217 {offsets = [0, 24], sizes = [16, 8], strides = [1, 1]} : vector<16x32xf32> to vector<16x8xf32>
    %281 = tpu.transpose %279, [1, 0] : vector<16x8xf32> -> vector<8x16xf32>
    %cst_124 = arith.constant dense<0.000000e+00> : vector<16x16xf32>
    %282 = tpu.matmul %278, %281, %cst_124 {dimension_numbers = #tpu.dot_dimension_numbers<[1], [0], [0], [1], [0, 0, 1, 1], [], []>} : vector<16x8xf32>, vector<8x16xf32>, vector<16x16xf32> -> vector<16x16xf32>
    %cst_125 = arith.constant 0.353553385 : f32
    %283 = vector.broadcast %cst_125 : f32 to vector<16x16xf32>
    %284 = arith.mulf %282, %283 : vector<16x16xf32>
    %285 = arith.addf %284, %32 : vector<16x16xf32>
    %cst_126 = arith.constant dense<0xFF800000> : vector<16xf32>
    %286 = vector.multi_reduction <maximumf>, %285, %cst_126 [1] : vector<16x16xf32> to vector<16xf32>
    %287 = vector.shape_cast %286 : vector<16xf32> to vector<16x1xf32>
    %288 = vector.broadcast %287 : vector<16x1xf32> to vector<16x16xf32>
    %289 = arith.subf %285, %288 : vector<16x16xf32>
    %290 = math.exp %289 : vector<16x16xf32>
    %cst_127 = arith.constant dense<0.000000e+00> : vector<16xf32>
    %291 = vector.multi_reduction <add>, %290, %cst_127 [1] : vector<16x16xf32> to vector<16xf32>
    %292 = vector.shape_cast %291 : vector<16xf32> to vector<16x1xf32>
    %293 = tpu.reciprocal %292 {approx = true} : vector<16x1xf32> -> vector<16x1xf32>
    %294 = vector.broadcast %293 : vector<16x1xf32> to vector<16x16xf32>
    %295 = arith.mulf %290, %294 : vector<16x16xf32>
    %cst_128 = arith.constant dense<0.000000e+00> : vector<16x8xf32>
    %296 = tpu.matmul %295, %280, %cst_128 {dimension_numbers = #tpu.dot_dimension_numbers<[1], [0], [0], [1], [0, 0, 1, 1], [], []>} : vector<16x16xf32>, vector<16x8xf32>, vector<16x8xf32> -> vector<16x8xf32>
    %c0_129 = arith.constant 0 : index
    %c24_130 = arith.constant 24 : index
    %297 = vector.load %arg21[%c0_129, %c24_130] : memref<16x32xf32, #tpu.memory_space<vmem>>, vector<16x8xf32>
    tpu.vector_store %arg21[%c0_129, %c24_130], %296 {strides = array<i32>} : memref<16x32xf32, #tpu.memory_space<vmem>>, vector<16x8xf32>,
    %c0_131 = arith.constant 0 : index
    %c0_132 = arith.constant 0 : index
    %298 = vector.load %arg21[%c0_131, %c0_132] : memref<16x32xf32, #tpu.memory_space<vmem>>, vector<16x32xf32>
    %c1_133 = arith.constant 1 : index
    %c0_134 = arith.constant 0 : index
    %c0_135 = arith.constant 0 : index
    %299 = vector.load %arg8[%c1_133, %c0_134, %c0_135] : memref<2x32x32xf32, #tpu.memory_space<vmem>>, vector<1x32x32xf32>
    %300 = vector.shape_cast %299 : vector<1x32x32xf32> to vector<32x32xf32>
    %cst_136 = arith.constant dense<0.000000e+00> : vector<16x32xf32>
    %301 = tpu.matmul %298, %300, %cst_136 {dimension_numbers = #tpu.dot_dimension_numbers<[1], [0], [0], [1], [0, 0, 1, 1], [], []>} : vector<16x32xf32>, vector<32x32xf32>, vector<16x32xf32> -> vector<16x32xf32>
    %c1_137 = arith.constant 1 : index
    %c0_138 = arith.constant 0 : index
    %c0_139 = arith.constant 0 : index
    %302 = vector.load %arg9[%c1_137, %c0_138, %c0_139] : memref<2x1x32xf32, #tpu.memory_space<vmem>>, vector<1x1x32xf32>
    %303 = vector.shape_cast %302 : vector<1x1x32xf32> to vector<1x32xf32>
    %304 = vector.broadcast %303 : vector<1x32xf32> to vector<16x32xf32>
    %305 = arith.addf %301, %304 : vector<16x32xf32>
    %306 = arith.addf %207, %305 : vector<16x32xf32>
    %c1_140 = arith.constant 1 : index
    %c0_141 = arith.constant 0 : index
    %c0_142 = arith.constant 0 : index
    %307 = vector.load %arg10[%c1_140, %c0_141, %c0_142] : memref<2x1x32xf32, #tpu.memory_space<vmem>>, vector<1x1x32xf32>
    %308 = vector.shape_cast %307 : vector<1x1x32xf32> to vector<1x32xf32>
    %c1_143 = arith.constant 1 : index
    %c0_144 = arith.constant 0 : index
    %c0_145 = arith.constant 0 : index
    %309 = vector.load %arg11[%c1_143, %c0_144, %c0_145] : memref<2x1x32xf32, #tpu.memory_space<vmem>>, vector<1x1x32xf32>
    %310 = vector.shape_cast %309 : vector<1x1x32xf32> to vector<1x32xf32>
    %cst_146 = arith.constant dense<0.000000e+00> : vector<16xf32>
    %311 = vector.multi_reduction <add>, %306, %cst_146 [1] : vector<16x32xf32> to vector<16xf32>
    %312 = vector.shape_cast %311 : vector<16xf32> to vector<16x1xf32>
    %cst_147 = arith.constant 3.200000e+01 : f32
    %313 = vector.broadcast %cst_147 : f32 to vector<16x1xf32>
    %314 = arith.divf %312, %313 : vector<16x1xf32>
    %315 = vector.broadcast %314 : vector<16x1xf32> to vector<16x32xf32>
    %316 = arith.subf %306, %315 : vector<16x32xf32>
    %317 = arith.mulf %316, %316 : vector<16x32xf32>
    %cst_148 = arith.constant dense<0.000000e+00> : vector<16xf32>
    %318 = vector.multi_reduction <add>, %317, %cst_148 [1] : vector<16x32xf32> to vector<16xf32>
    %319 = vector.shape_cast %318 : vector<16xf32> to vector<16x1xf32>
    %cst_149 = arith.constant 3.200000e+01 : f32
    %320 = vector.broadcast %cst_149 : f32 to vector<16x1xf32>
    %321 = arith.divf %319, %320 : vector<16x1xf32>
    %cst_150 = arith.constant 9.99999996E-13 : f32
    %322 = vector.broadcast %cst_150 : f32 to vector<16x1xf32>
    %323 = arith.addf %321, %322 : vector<16x1xf32>
    %324 = math.rsqrt %323 : vector<16x1xf32>
    %325 = vector.broadcast %324 : vector<16x1xf32> to vector<16x32xf32>
    %326 = arith.mulf %316, %325 : vector<16x32xf32>
    %327 = vector.broadcast %308 : vector<1x32xf32> to vector<16x32xf32>
    %328 = arith.mulf %326, %327 : vector<16x32xf32>
    %329 = vector.broadcast %310 : vector<1x32xf32> to vector<16x32xf32>
    %330 = arith.addf %328, %329 : vector<16x32xf32>
    %c1_151 = arith.constant 1 : index
    %c0_152 = arith.constant 0 : index
    %c0_153 = arith.constant 0 : index
    %331 = vector.load %arg12[%c1_151, %c0_152, %c0_153] : memref<2x32x64xf32, #tpu.memory_space<vmem>>, vector<1x32x64xf32>
    %332 = vector.shape_cast %331 : vector<1x32x64xf32> to vector<32x64xf32>
    %cst_154 = arith.constant dense<0.000000e+00> : vector<16x64xf32>
    %333 = tpu.matmul %330, %332, %cst_154 {dimension_numbers = #tpu.dot_dimension_numbers<[1], [0], [0], [1], [0, 0, 1, 1], [], []>} : vector<16x32xf32>, vector<32x64xf32>, vector<16x64xf32> -> vector<16x64xf32>
    %c1_155 = arith.constant 1 : index
    %c0_156 = arith.constant 0 : index
    %c0_157 = arith.constant 0 : index
    %334 = vector.load %arg13[%c1_155, %c0_156, %c0_157] : memref<2x1x64xf32, #tpu.memory_space<vmem>>, vector<1x1x64xf32>
    %335 = vector.shape_cast %334 : vector<1x1x64xf32> to vector<1x64xf32>
    %336 = vector.broadcast %335 : vector<1x64xf32> to vector<16x64xf32>
    %337 = arith.addf %333, %336 : vector<16x64xf32>
    %cst_158 = arith.constant 5.000000e-01 : f32
    %338 = vector.broadcast %cst_158 : f32 to vector<16x64xf32>
    %339 = arith.mulf %338, %337 : vector<16x64xf32>
    %cst_159 = arith.constant 4.471500e-02 : f32
    %340 = vector.broadcast %cst_159 : f32 to vector<16x64xf32>
    %341 = arith.mulf %340, %337 : vector<16x64xf32>
    %342 = arith.mulf %341, %337 : vector<16x64xf32>
    %343 = arith.mulf %342, %337 : vector<16x64xf32>
    %344 = arith.addf %337, %343 : vector<16x64xf32>
    %cst_160 = arith.constant 0.797884583 : f32
    %345 = vector.broadcast %cst_160 : f32 to vector<16x64xf32>
    %346 = arith.mulf %345, %344 : vector<16x64xf32>
    %347 = math.tanh %346 : vector<16x64xf32>
    %cst_161 = arith.constant 1.000000e+00 : f32
    %348 = vector.broadcast %cst_161 : f32 to vector<16x64xf32>
    %349 = arith.addf %348, %347 : vector<16x64xf32>
    %350 = arith.mulf %339, %349 : vector<16x64xf32>
    %c1_162 = arith.constant 1 : index
    %c0_163 = arith.constant 0 : index
    %c0_164 = arith.constant 0 : index
    %351 = vector.load %arg14[%c1_162, %c0_163, %c0_164] : memref<2x64x32xf32, #tpu.memory_space<vmem>>, vector<1x64x32xf32>
    %352 = vector.shape_cast %351 : vector<1x64x32xf32> to vector<64x32xf32>
    %cst_165 = arith.constant dense<0.000000e+00> : vector<16x32xf32>
    %353 = tpu.matmul %350, %352, %cst_165 {dimension_numbers = #tpu.dot_dimension_numbers<[1], [0], [0], [1], [0, 0, 1, 1], [], []>} : vector<16x64xf32>, vector<64x32xf32>, vector<16x32xf32> -> vector<16x32xf32>
    %c1_166 = arith.constant 1 : index
    %c0_167 = arith.constant 0 : index
    %c0_168 = arith.constant 0 : index
    %354 = vector.load %arg15[%c1_166, %c0_167, %c0_168] : memref<2x1x32xf32, #tpu.memory_space<vmem>>, vector<1x1x32xf32>
    %355 = vector.shape_cast %354 : vector<1x1x32xf32> to vector<1x32xf32>
    %356 = vector.broadcast %355 : vector<1x32xf32> to vector<16x32xf32>
    %357 = arith.addf %353, %356 : vector<16x32xf32>
    %358 = arith.addf %330, %357 : vector<16x32xf32>
    %c1_169 = arith.constant 1 : index
    %c0_170 = arith.constant 0 : index
    %c0_171 = arith.constant 0 : index
    %359 = vector.load %arg16[%c1_169, %c0_170, %c0_171] : memref<2x1x32xf32, #tpu.memory_space<vmem>>, vector<1x1x32xf32>
    %360 = vector.shape_cast %359 : vector<1x1x32xf32> to vector<1x32xf32>
    %c1_172 = arith.constant 1 : index
    %c0_173 = arith.constant 0 : index
    %c0_174 = arith.constant 0 : index
    %361 = vector.load %arg17[%c1_172, %c0_173, %c0_174] : memref<2x1x32xf32, #tpu.memory_space<vmem>>, vector<1x1x32xf32>
    %362 = vector.shape_cast %361 : vector<1x1x32xf32> to vector<1x32xf32>
    %cst_175 = arith.constant dense<0.000000e+00> : vector<16xf32>
    %363 = vector.multi_reduction <add>, %358, %cst_175 [1] : vector<16x32xf32> to vector<16xf32>
    %364 = vector.shape_cast %363 : vector<16xf32> to vector<16x1xf32>
    %cst_176 = arith.constant 3.200000e+01 : f32
    %365 = vector.broadcast %cst_176 : f32 to vector<16x1xf32>
    %366 = arith.divf %364, %365 : vector<16x1xf32>
    %367 = vector.broadcast %366 : vector<16x1xf32> to vector<16x32xf32>
    %368 = arith.subf %358, %367 : vector<16x32xf32>
    %369 = arith.mulf %368, %368 : vector<16x32xf32>
    %cst_177 = arith.constant dense<0.000000e+00> : vector<16xf32>
    %370 = vector.multi_reduction <add>, %369, %cst_177 [1] : vector<16x32xf32> to vector<16xf32>
    %371 = vector.shape_cast %370 : vector<16xf32> to vector<16x1xf32>
    %cst_178 = arith.constant 3.200000e+01 : f32
    %372 = vector.broadcast %cst_178 : f32 to vector<16x1xf32>
    %373 = arith.divf %371, %372 : vector<16x1xf32>
    %cst_179 = arith.constant 9.99999996E-13 : f32
    %374 = vector.broadcast %cst_179 : f32 to vector<16x1xf32>
    %375 = arith.addf %373, %374 : vector<16x1xf32>
    %376 = math.rsqrt %375 : vector<16x1xf32>
    %377 = vector.broadcast %376 : vector<16x1xf32> to vector<16x32xf32>
    %378 = arith.mulf %368, %377 : vector<16x32xf32>
    %379 = vector.broadcast %360 : vector<1x32xf32> to vector<16x32xf32>
    %380 = arith.mulf %378, %379 : vector<16x32xf32>
    %381 = vector.broadcast %362 : vector<1x32xf32> to vector<16x32xf32>
    %382 = arith.addf %380, %381 : vector<16x32xf32>
    %c0_180 = arith.constant 0 : index
    %c0_181 = arith.constant 0 : index
    %383 = vector.load %arg18[%c0_180, %c0_181] : memref<32x128xf32, #tpu.memory_space<vmem>>, vector<32x128xf32>
    %cst_182 = arith.constant dense<0.000000e+00> : vector<16x128xf32>
    %384 = tpu.matmul %382, %383, %cst_182 {dimension_numbers = #tpu.dot_dimension_numbers<[1], [0], [0], [1], [0, 0, 1, 1], [], []>} : vector<16x32xf32>, vector<32x128xf32>, vector<16x128xf32> -> vector<16x128xf32>
    %c0_183 = arith.constant 0 : index
    %c0_184 = arith.constant 0 : index
    %385 = vector.load %arg19[%c0_183, %c0_184] : memref<1x128xf32, #tpu.memory_space<vmem>>, vector<1x128xf32>
    %386 = vector.broadcast %385 : vector<1x128xf32> to vector<16x128xf32>
    %387 = arith.addf %384, %386 : vector<16x128xf32>
    %cst_185 = arith.constant dense<0xFF800000> : vector<16xf32>
    %388 = vector.multi_reduction <maximumf>, %387, %cst_185 [1] : vector<16x128xf32> to vector<16xf32>
    %389 = vector.shape_cast %388 : vector<16xf32> to vector<16x1xf32>
    %390 = vector.broadcast %389 : vector<16x1xf32> to vector<16x128xf32>
    %391 = arith.subf %387, %390 : vector<16x128xf32>
    %392 = math.exp %391 : vector<16x128xf32>
    %cst_186 = arith.constant dense<0.000000e+00> : vector<16xf32>
    %393 = vector.multi_reduction <add>, %392, %cst_186 [1] : vector<16x128xf32> to vector<16xf32>
    %394 = vector.shape_cast %393 : vector<16xf32> to vector<16x1xf32>
    %395 = math.log %394 : vector<16x1xf32>
    %396 = vector.broadcast %395 : vector<16x1xf32> to vector<16x128xf32>
    %397 = arith.subf %391, %396 : vector<16x128xf32>
    %c0_187 = arith.constant 0 : index
    %c0_188 = arith.constant 0 : index
    %398 = vector.load %arg20[%c0_187, %c0_188] : memref<16x128xf32, #tpu.memory_space<vmem>>, vector<16x128xf32>
    tpu.vector_store %arg20[%c0_187, %c0_188], %397 {strides = array<i32>} : memref<16x128xf32, #tpu.memory_space<vmem>>, vector<16x128xf32>,
    return
  }
}

</mosaic_0001>

<bundles_post_ra>
// kernel: bert_for_punctuator.1
= control target key start
LH: loop header
LB: loop body
LE: loop exit
PB: predicated region body
PF: predicated region fallthrough
CT: control target
= control target key end

     0   :  { %v3660_v0 = vmov 0   ;;  %v67_v19 = vlaneseq  ;;  %v3661_v22 = vmov 1.0   ;;  %vm176_vm2 = vcmask 261120   ;;  %s3664_s26 = smov 120   ;;  %s3665_s27 = smov 88   ;;  %s4356_s0 = inlined_call_operand.vmem [shape: s32[16,1], index: 0, kind: input, shape index: {}]   ;;  %s4357_s2 = inlined_call_operand.vmem [shape: f32[128,32], index: 2, kind: input, shape index: {}]   ;;  %s4358_s3 = inlined_call_operand.vmem [shape: f32[16,32], index: 3, kind: input, shape index: {}]   ;;  %s4359_s6 = inlined_call_operand.vmem [shape: f32[2,32,96], index: 6, kind: input, shape index: {}]   ;;  %s4360_s4 = inlined_call_operand.vmem [shape: f32[1,32], index: 4, kind: input, shape index: {}]   ;;  %s4361_s5 = inlined_call_operand.vmem [shape: f32[1,32], index: 5, kind: input, shape index: {}]   ;;  %s4362_s7 = inlined_call_operand.vmem [shape: f32[2,1,96], index: 7, kind: input, shape index: {}]   ;;  %s4363_s1 = inlined_call_operand.vmem [shape: f32[16,16], index: 1, kind: input, shape index: {}]   ;;  %s4364_s8 = inlined_call_operand.vmem [shape: f32[2,32,32], index: 8, kind: input, shape index: {}]   ;;  %s4365_s9 = inlined_call_operand.vmem [shape: f32[2,1,32], index: 9, kind: input, shape index: {}]   ;;  %s4366_s12 = inlined_call_operand.vmem [shape: f32[2,32,64], index: 12, kind: input, shape index: {}]   ;;  %s4367_s10 = inlined_call_operand.vmem [shape: f32[2,1,32], index: 10, kind: input, shape index: {}]   ;;  %s4368_s11 = inlined_call_operand.vmem [shape: f32[2,1,32], index: 11, kind: input, shape index: {}]   ;;  %s4369_s14 = inlined_call_operand.vmem [shape: f32[2,64,32], index: 14, kind: input, shape index: {}]   ;;  %s4370_s13 = inlined_call_operand.vmem [shape: f32[2,1,64], index: 13, kind: input, shape index: {}]   ;;  %s4371_s15 = inlined_call_operand.vmem [shape: f32[2,1,32], index: 15, kind: input, shape index: {}]   ;;  %s4372_s16 = inlined_call_operand.vmem [shape: f32[2,1,32], index: 16, kind: input, shape index: {}]   ;;  %s4373_s17 = inlined_call_operand.vmem [shape: f32[2,1,32], index: 17, kind: input, shape index: {}]   ;;  %s4374_s18 = inlined_call_operand.vmem [shape: f32[32,128], index: 18, kind: input, shape index: {}]   ;;  %s4375_s19 = inlined_call_operand.vmem [shape: f32[1,128], index: 19, kind: input, shape index: {}]   ;;  %s4376_s20 = inlined_call_operand.vmem [shape: f32[16,128], index: 20, kind: output, shape index: {}]  }
   0x1   :  { %4395 = sst [smem:[#allocation3_spill]] %s4356_s0  ;;  %3557 = vset.pattern.permute.xlu0 %v3660_v0  ;;  %v3023_v55 = vld [vmem:[%s4361_s5] ss:$0 sm:$0xff]  ;;  %vm320_vm3 = vcmask 64512   ;;  %s3662_s5 = smov 96   ;;  %vm408_vm4 = vcmask 130048  }
   0x2   :  { %4396 = sst [smem:[#allocation4_spill]] %s4357_s2  ;;  %v68_v20 = vand.u32 127, %v67_v19  ;;  %v3024_v62 = vld [vmem:[%s4362_s7] ss:$0 sm:$0xff]  ;;  %s3666_s28 = smov 112   ;;  %vm732_vm5 = vcmask 130112  }
   0x3   :  { %4397 = sst [smem:[#allocation5_spill]] %s4358_s3  ;;  %s4389_s0 = smov 72   ;;  %vm947_vm6 = vcmask 195712   ;;  %vm1162_vm7 = vcmask 261312   ;;  %vm1430_vm8 = vcmask 523264  }
   0x4   :  { %4398 = sst [smem:[#allocation6_spill]] %s4359_s6  ;;  %s3663_s6 = smov 64  }
   0x5   :  { %4399 = sst [smem:[#allocation7_spill]] %s4360_s4  ;;  %s3667_s4 = smov 80  }
   0x6   :  { %s4400_s23 = sld [smem:[#allocation3_spill]]  ;;  %s4385_s21 = smov 40  }
   0x7   :  { %s4401_s25 = sld [smem:[#allocation4_spill]]  ;;  %s4383_s2 = smov 8  }
   0x8   :  { %s4402_s30 = sld [smem:[#allocation5_spill]]  ;;  %s4393_s24 = smov 24  }
   0x9   :  { %s4403_s22 = sld [smem:[#allocation6_spill]]  ;;  %s4410_s3 = smov 16  }
   0xa   :  { %s4404_s29 = sld [smem:[#allocation7_spill]] }
   0xc   :  { %v65_v1 = vld [vmem:[%s4400_s23] sm:$0xff]  ;;  %v66_v4 = vld [vmem:[%s4400_s23 + $0x8] sm:$0xff]  ;;  %s4381_s23 = smov 16  }
   0xd   :  { %v96_v2 = vld [vmem:[%s4401_s25 + $0x78] sm:$0xff]  ;;  %70 = vperm.xlu0 %3557, %v65_v1   ;;  %v95_v3 = vld [vmem:[%s4401_s25 + $0x70] sm:$0xff]  ;;  %v94_v5 = vld [vmem:[%s4401_s25 + $0x68] sm:$0xff] }
   0xe   :  { %3279 = vmatprep.subr.mxu0 %v96_v2  ;;  %v93_v6 = vld [vmem:[%s4401_s25 + $0x60] sm:$0xff]  ;;  %v92_v7 = vld [vmem:[%s4401_s25 + $0x58] sm:$0xff]  ;;  %v91_v8 = vld [vmem:[%s4401_s25 + $0x50] sm:$0xff] }
   0xf   :  { %3280 = vmatpush3.msra.mxu0 %v96_v2  ;;  %v90_v9 = vld [vmem:[%s4401_s25 + $0x48] sm:$0xff]  ;;  %v89_v10 = vld [vmem:[%s4401_s25 + $0x40] sm:$0xff]  ;;  %v88_v11 = vld [vmem:[%s4401_s25 + $0x38] sm:$0xff] }
  0x10   :  { %3281 = vmatprep.subr.mxu0 %v95_v3  ;;  %v87_v12 = vld [vmem:[%s4401_s25 + $0x30] sm:$0xff]  ;;  %v86_v13 = vld [vmem:[%s4401_s25 + $0x28] sm:$0xff]  ;;  %v85_v14 = vld [vmem:[%s4401_s25 + $0x20] sm:$0xff] }
  0x11   :  { %3282 = vmatpush3.msra.mxu0 %v95_v3  ;;  %73 = vperm.xlu0 %3557, %v66_v4   ;;  %v84_v15 = vld [vmem:[%s4401_s25 + $0x18] sm:$0xff]  ;;  %v83_v16 = vld [vmem:[%s4401_s25 + $0x10] sm:$0xff]  ;;  %v82_v17 = vld [vmem:[%s4401_s25 + $0x8] sm:$0xff] }
  0x12   :  { %3283 = vmatprep.subr.mxu0 %v94_v5  ;;  %v81_v18 = vld [vmem:[%s4401_s25] sm:$0xff]  ;;  %v98_v26 = vld [vmem:[%s4402_s30 + $0x8] sm:$0xff]  ;;  %v225_v42 = vld [vmem:[%s4403_s22 + $0x18] sm:$0xff]  ;;  %s4387_s25 = smov 104  }
  0x13   :  { %3284 = vmatpush3.msra.mxu0 %v94_v5  ;;  %v97_v25 = vld [vmem:[%s4402_s30] sm:$0xff]  ;;  %v224_v43 = vld [vmem:[%s4403_s22 + $0x10] sm:$0xff]  ;;  %3314 = vmatprep.subr.mxu1 %v225_v42  ;;  %v223_v44 = vld [vmem:[%s4403_s22 + $0x8] sm:$0xff]  ;;  %s4391_s30 = smov 48  }
  0x14   :  { %3285 = vmatprep.subr.mxu0 %v93_v6  ;;  %3315 = vmatpush3.msra.mxu1 %v225_v42  ;;  %v222_v45 = vld [vmem:[%s4403_s22] sm:$0xff] }
  0x15   :  { %3286 = vmatpush3.msra.mxu0 %v93_v6  ;;  %3316 = vmatprep.subr.mxu1 %v224_v43  ;;  %v3022_v53 = vld [vmem:[%s4404_s29] ss:$0 sm:$0xff]  ;;  %v3893_v6 = vld [vmem:[%s4363_s1 + $0x8] sm:$0xff]  ;;  %s3668_s29 = smov 56  }
  0x16   :  { %3287 = vmatprep.subr.mxu0 %v92_v7  ;;  %3317 = vmatpush3.msra.mxu1 %v224_v43 }
  0x17   :  { %3288 = vmatpush3.msra.mxu0 %v92_v7  ;;  %3318 = vmatprep.subr.mxu1 %v223_v44 }
  0x18   :  { %3289 = vmatprep.subr.mxu0 %v91_v8  ;;  %3319 = vmatpush3.msra.mxu1 %v223_v44 }
  0x19   :  { %3290 = vmatpush3.msra.mxu0 %v91_v8  ;;  %3320 = vmatprep.subr.mxu1 %v222_v45 }
  0x1a   :  { %3291 = vmatprep.subr.mxu0 %v90_v9  ;;  %3321 = vmatpush3.msra.mxu1 %v222_v45 }
  0x1b   :  { %3292 = vmatpush3.msra.mxu0 %v90_v9  ;;  %v3898_v9 = vld [vmem:[%s4363_s1] sm:$0xff] }
  0x1c   :  { %3293 = vmatprep.subr.mxu0 %v89_v10 }
  0x1d   :  { %3294 = vmatpush3.msra.mxu0 %v89_v10 }
  0x1e   :  { %3295 = vmatprep.subr.mxu0 %v88_v11 }
  0x1f   :  { %3296 = vmatpush3.msra.mxu0 %v88_v11 }
  0x20   :  { %3297 = vmatprep.subr.mxu0 %v87_v12 }
  0x21   :  { %3298 = vmatpush3.msra.mxu0 %v87_v12 }
  0x22   :  { %3299 = vmatprep.subr.mxu0 %v86_v13 }
  0x23   :  { %3300 = vmatpush3.msra.mxu0 %v86_v13 }
  0x24   :  { %3301 = vmatprep.subr.mxu0 %v85_v14 }
  0x25   :  { %3302 = vmatpush3.msra.mxu0 %v85_v14 }
  0x26   :  { %3303 = vmatprep.subr.mxu0 %v84_v15 }
  0x27   :  { %3304 = vmatpush3.msra.mxu0 %v84_v15 }
  0x28   :  { %3305 = vmatprep.subr.mxu0 %v83_v16 }
  0x29   :  { %3306 = vmatpush3.msra.mxu0 %v83_v16 }
  0x2a   :  { %3307 = vmatprep.subr.mxu0 %v82_v17 }
  0x2b   :  { %3308 = vmatpush3.msra.mxu0 %v82_v17 }
  0x2c   :  { %3309 = vmatprep.subr.mxu0 %v81_v18 }
  0x2d   :  { %3310 = vmatpush3.msra.mxu0 %v81_v18 }
  0x88   :  { %v71_v21 = vpop.permute.xlu0 %70 }
  0x89   :  { %vm75_vm0 = vcmp.eq.s32.totalorder %v68_v20, %v71_v21 }
  0x8a   :  { %3311 = vmatprep.mubr.msk.f32.mxu0 %vm75_vm0, %v3661_v22 }
  0x8c   :  { %v74_v23 = vpop.permute.xlu0 %73 }
  0x8d   :  { %vm76_vm1 = vcmp.eq.s32.totalorder %v68_v20, %v74_v23 }
  0x8e   :  { %3312 = vmatmul.mubr.msk.f32.vlgmr.msra.gmra.mxu0 %vm76_vm1, %v3661_v22 }
 0x14e   :  { %v3313_v24 = vpop.f32.mrf.mxu0 }
 0x14f   :  { %v171_v29 = vadd.f32 %v3313_v24, %v98_v26 }
 0x150   :  { %v165_v27 = vpop.f32.mrf.mxu0 }
 0x151   :  { %v166_v28 = vadd.f32 %v165_v27, %v97_v25  ;;  %v180_v31 = vsel %vm176_vm2, %v171_v29, 0.0 }
 0x153   :  { %v177_v30 = vsel %vm176_vm2, %v166_v28, 0.0 }
 0x154   :  { %178 = vadd.xlane.f32.xlu1 %v177_v30 }
 0x158   :  { %181 = vadd.xlane.f32.xlu1 %v180_v31 }
 0x1dd   :  { %v179_v32 = vpop.xlane.xlu1 %178 }
 0x1de   :  { %v184_v33 = vmul.f32 0.03125, %v179_v32 }
 0x1e0   :  { %v186_v34 = vsub.f32 %v166_v28, %v184_v33 }
 0x1e1   :  { %v182_v35 = vpop.xlane.xlu1 %181 }
 0x1e2   :  { %v185_v36 = vmul.f32 0.03125, %v182_v35  ;;  %v188_v37 = vmul.f32 %v186_v34, %v186_v34 }
 0x1e4   :  { %v187_v38 = vsub.f32 %v171_v29, %v185_v36  ;;  %v190_v39 = vsel %vm176_vm2, %v188_v37, 0.0 }
 0x1e5   :  { %191 = vadd.xlane.f32.xlu0 %v190_v39 }
 0x1e6   :  { %v189_v40 = vmul.f32 %v187_v38, %v187_v38 }
 0x1e8   :  { %v193_v41 = vsel %vm176_vm2, %v189_v40, 0.0 }
 0x1e9   :  { %194 = vadd.xlane.f32.xlu1 %v193_v41 }
 0x26e   :  { %v192_v46 = vpop.xlane.xlu0 %191 }
 0x26f   :  { %v196_v47 = vmul.f32 0.03125, %v192_v46 }
 0x271   :  { %v198_v48 = vadd.f32 1e-12, %v196_v47 }
 0x272   :  { %v195_v49 = vpop.xlane.xlu1 %194 }
 0x273   :  { %3558 = vrsqrt.f32 %v198_v48  ;;  %v197_v50 = vmul.f32 0.03125, %v195_v49 }
 0x275   :  { %v199_v51 = vadd.f32 1e-12, %v197_v50 }
 0x277   :  { %3560 = vrsqrt.f32 %v199_v51 }
 0x280   :  { %v3559_v52 = vpop.eup %3558 }
 0x281   :  { %v202_v54 = vmul.f32 %v3559_v52, %v186_v34 }
 0x283   :  { %v210_v56 = vmul.f32 %v3022_v53, %v202_v54 }
 0x284   :  { %v3561_v57 = vpop.eup %3560 }
 0x285   :  { %v203_v58 = vmul.f32 %v3561_v57, %v187_v38  ;;  %v3863_v59 = vadd.f32 %v3023_v55, %v210_v56 }
 0x287   :  { %v211_v60 = vmul.f32 %v3022_v53, %v203_v58  ;;  %3322 = vmatprep.mubr.msk.f32.mxu1 %vm176_vm2, %v3863_v59 }
 0x289   :  { %v3867_v61 = vadd.f32 %v3023_v55, %v211_v60 }
 0x28b   :  { %3323 = vmatmul.mubr.msk.f32.vlgmr.msra.gmra.mxu1 %vm176_vm2, %v3867_v61 }
 0x34b   :  { %v3324_v63 = vpop.f32.mrf.mxu1 }
 0x34c   :  { %v3874_v0 = vadd.f32 %v3324_v63, %v3024_v62 }
 0x34d   :  { %v305_v1 = vpop.f32.mrf.mxu1 }
 0x34e   :  { %v3876_v2 = vadd.f32 %v3024_v62, %v305_v1  ;;  %318 = vrot.lane.b32.xlu1 %v3874_v0, %s3662_s5 }
 0x350   :  { %3329 = vmatprep.mubr.msk.f32.mxu1 %vm320_vm3, %v3876_v2 }
 0x352   :  { %316 = vrot.lane.b32.xlu1 %v3876_v2, %s3662_s5 }
 0x3c0   :  { %v319_v3 = vpop.permute.xlu1 %318 }
 0x3c1   :  { %3325 = vmatprep.subr.msk.mxu1 %vm320_vm3, %v319_v3 }
 0x3c2   :  { %3326 = vmatpush3.xpose.msk.msra.mxu1 %vm320_vm3, %v319_v3 }
 0x3c4   :  { %v317_v4 = vpop.permute.xlu1 %316 }
 0x3c5   :  { %3327 = vmatprep.subr.msk.mxu1 %vm320_vm3, %v317_v4 }
 0x3c6   :  { %3328 = vmatpush3.xpose.msk.msra.mxu1 %vm320_vm3, %v317_v4 }
 0x3c9   :  { %3330 = vmatmul.mubr.msk.f32.vlgmr.msra.gmra.mxu1 %vm320_vm3, %v3874_v0 }
 0x489   :  { %v3331_v5 = vpop.f32.mrf.mxu1 }
 0x48a   :  { %v405_v7 = vmul.f32 0.35355338, %v3331_v5 }
 0x48b   :  { %v395_v8 = vpop.f32.mrf.mxu1 }
 0x48c   :  { %v404_v10 = vmul.f32 0.35355338, %v395_v8  ;;  %v407_v11 = vadd.f32 %v405_v7, %v3893_v6 }
 0x48e   :  { %v412_v12 = vsel %vm408_vm4, %v407_v11, -inf  ;;  %v406_v13 = vadd.f32 %v404_v10, %v3898_v9 }
 0x48f   :  { %413 = vmax.xlane.f32.xlu0 %v412_v12 }
 0x490   :  { %v409_v14 = vsel %vm408_vm4, %v406_v13, -inf }
 0x491   :  { %410 = vmax.xlane.f32.xlu1 %v409_v14 }
 0x4a2   :  { %431 = vrot.lane.b32.xlu1 %v3876_v2, %s3663_s6 }
 0x4a5   :  { %433 = vrot.lane.b32.xlu0 %v3874_v0, %s3663_s6 }
 0x4a6   :  { %522 = vrot.lane.b32.xlu1 %v3874_v0, %s3664_s26 }
 0x4a9   :  { %526 = vrot.lane.b32.xlu0 %v3874_v0, %s3665_s27 }
 0x4aa   :  { %735 = vrot.lane.b32.xlu1 %v3876_v2, %s3666_s28 }
 0x4ad   :  { %524 = vrot.lane.b32.xlu0 %v3876_v2, %s3665_s27 }
 0x518   :  { %v414_v15 = vpop.xlane.xlu0 %413 }
 0x519   :  { %v416_v16 = vsub.f32 %v407_v11, %v414_v15 }
 0x51a   :  { %v411_v17 = vpop.xlane.xlu1 %410 }
 0x51b   :  { %v419_v18 = vmul.f32 1.442695, %v416_v16  ;;  %v415_v19 = vsub.f32 %v406_v13, %v411_v17 }
 0x51c   :  { %v434_v20 = vpop.permute.xlu0 %433 }
 0x51d   :  { %3562 = vpow2.f32 %v419_v18  ;;  %v417_v21 = vmul.f32 1.442695, %v415_v19  ;;  %3332 = vmatprep.subr.mxu1 %v434_v20 }
 0x51e   :  { %3333 = vmatpush3.msra.mxu1 %v434_v20  ;;  %v432_v22 = vpop.permute.xlu1 %431 }
 0x51f   :  { %3564 = vpow2.f32 %v417_v21  ;;  %3334 = vmatprep.subr.mxu1 %v432_v22 }
 0x520   :  { %v527_v23 = vpop.permute.xlu0 %526  ;;  %3335 = vmatpush3.msra.mxu1 %v432_v22 }
 0x521   :  { %3339 = vmatprep.subr.msk.mxu1 %vm320_vm3, %v527_v23 }
 0x522   :  { %v523_v24 = vpop.permute.xlu1 %522 }
 0x524   :  { %v525_v30 = vpop.permute.xlu0 %524 }
 0x526   :  { %v736_v25 = vpop.permute.xlu1 %735 }
 0x527   :  { %3357 = vmatprep.mubr.msk.f32.mxu0 %vm320_vm3, %v736_v25 }
 0x52a   :  { %v3563_v26 = vpop.eup %3562 }
 0x52b   :  { %v424_v27 = vsel %vm408_vm4, %v3563_v26, 0.0 }
 0x52c   :  { %v3565_v28 = vpop.eup %3564  ;;  %425 = vadd.xlane.f32.xlu0 %v424_v27 }
 0x52d   :  { %v421_v29 = vsel %vm408_vm4, %v3565_v28, 0.0 }
 0x530   :  { %422 = vadd.xlane.f32.xlu0 %v421_v29 }
 0x546   :  { %741 = vrot.lane.b32.xlu0 %v3874_v0, %s3667_s4 }
 0x54a   :  { %520 = vrot.lane.b32.xlu0 %v3876_v2, %s3664_s26 }
 0x54e   :  { %739 = vrot.lane.b32.xlu0 %v3876_v2, %s3667_s4 }
 0x552   :  { %737 = vrot.lane.b32.xlu0 %v3874_v0, %s3666_s28 }
 0x5b5   :  { %v426_v31 = vpop.xlane.xlu0 %425 }
 0x5b6   :  { %3566 = vrcp.f32 %v426_v31 }
 0x5b9   :  { %v423_v32 = vpop.xlane.xlu0 %422 }
 0x5ba   :  { %3568 = vrcp.f32 %v423_v32 }
 0x5bd   :  { %v742_v33 = vpop.permute.xlu0 %741 }
 0x5be   :  { %3353 = vmatprep.subr.msk.mxu0 %vm320_vm3, %v742_v33 }
 0x5bf   :  { %3354 = vmatpush3.xpose.msk.msra.mxu0 %vm320_vm3, %v742_v33 }
 0x5c1   :  { %v521_v34 = vpop.permute.xlu0 %520 }
 0x5c3   :  { %v3567_v36 = vpop.eup %3566 }
 0x5c4   :  { %v430_v40 = vmul.f32 %v3567_v36, %v3563_v26 }
 0x5c5   :  { %v740_v35 = vpop.permute.xlu0 %739 }
 0x5c6   :  { %3355 = vmatprep.subr.msk.mxu0 %vm320_vm3, %v740_v35 }
 0x5c7   :  { %v3569_v37 = vpop.eup %3568  ;;  %3356 = vmatpush3.xpose.msk.msra.mxu0 %vm320_vm3, %v740_v35 }
 0x5c8   :  { %v429_v38 = vmul.f32 %v3569_v37, %v3565_v28 }
 0x5c9   :  { %v738_v39 = vpop.permute.xlu0 %737 }
 0x5ca   :  { %3336 = vmatprep.mubr.msk.f32.mxu1 %vm408_vm4, %v429_v38  ;;  %3358 = vmatmul.mubr.msk.f32.vlgmr.msra.gmra.mxu0 %vm320_vm3, %v738_v39 }
 0x5cb   :  { %3337 = vmatmul.mubr.msk.f32.vlgmr.msra.gmra.mxu1 %vm408_vm4, %v430_v40 }
 0x5cc   :  { %3340 = vmatpush3.xpose.msk.msra.mxu1 %vm320_vm3, %v527_v23  ;;  %3343 = vmatprep.mubr.msk.f32.mxu1 %vm320_vm3, %v521_v34 }
 0x5cd   :  { %3341 = vmatprep.subr.msk.mxu1 %vm320_vm3, %v525_v30 }
 0x5d0   :  { %3342 = vmatpush3.xpose.msk.msra.mxu1 %vm320_vm3, %v525_v30 }
 0x5d3   :  { %3344 = vmatmul.mubr.msk.f32.vlgmr.msra.gmra.mxu1 %vm320_vm3, %v523_v24 }
 0x68a   :  { %v3359_v42 = vpop.f32.mrf.mxu0 }
 0x68b   :  { %v3338_v41 = vpop.f32.mrf.mxu1  ;;  %v827_v49 = vmul.f32 0.35355338, %v3359_v42 }
 0x68c   :  { %519 = vst.msk [vmem:[#allocation2 + $0x8] sm:$0xff] %vm320_vm3, %v3338_v41  ;;  %v817_v44 = vpop.f32.mrf.mxu0 }
 0x68d   :  { %v509_v43 = vpop.f32.mrf.mxu1  ;;  %v826_v46 = vmul.f32 0.35355338, %v817_v44  ;;  %v829_v56 = vadd.f32 %v827_v49, %v3893_v6 }
 0x68e   :  { %518 = vst.msk [vmem:[#allocation2] sm:$0xff] %vm320_vm3, %v509_v43 }
 0x68f   :  { %v828_v54 = vadd.f32 %v826_v46, %v3898_v9  ;;  %v833_v58 = vsel %vm408_vm4, %v829_v56, -inf }
 0x691   :  { %v830_v57 = vsel %vm408_vm4, %v828_v54, -inf }
 0x693   :  { %v3345_v45 = vpop.f32.mrf.mxu1 }
 0x694   :  { %v612_v47 = vmul.f32 0.35355338, %v3345_v45 }
 0x695   :  { %v602_v48 = vpop.f32.mrf.mxu1 }
 0x696   :  { %v611_v50 = vmul.f32 0.35355338, %v602_v48  ;;  %v614_v51 = vadd.f32 %v612_v47, %v3893_v6 }
 0x698   :  { %v618_v52 = vsel %vm408_vm4, %v614_v51, -inf  ;;  %v613_v53 = vadd.f32 %v611_v50, %v3898_v9 }
 0x699   :  { %619 = vmax.xlane.f32.xlu0 %v618_v52 }
 0x69a   :  { %v615_v55 = vsel %vm408_vm4, %v613_v53, -inf }
 0x69b   :  { %616 = vmax.xlane.f32.xlu1 %v615_v55 }
 0x69d   :  { %831 = vmax.xlane.f32.xlu0 %v830_v57 }
 0x69f   :  { %834 = vmax.xlane.f32.xlu1 %v833_v58 }
 0x722   :  { %v620_v60 = vpop.xlane.xlu0 %619 }
 0x723   :  { %v622_v15 = vsub.f32 %v614_v51, %v620_v60 }
 0x724   :  { %v617_v62 = vpop.xlane.xlu1 %616 }
 0x725   :  { %v621_v13 = vsub.f32 %v613_v53, %v617_v62  ;;  %v625_v16 = vmul.f32 1.442695, %v622_v15  ;;  %v1170_v15 = vld [vmem:[%s4364_s8 + $0x18] sm:$0xff] }
 0x726   :  { %v832_v63 = vpop.xlane.xlu0 %831  ;;  %3381 = vmatprep.subr.mxu0 %v1170_v15 }
 0x727   :  { %v836_v1 = vsub.f32 %v828_v54, %v832_v63  ;;  %v623_v14 = vmul.f32 1.442695, %v621_v13  ;;  %3382 = vmatpush3.msra.mxu0 %v1170_v15 }
 0x728   :  { %v835_v3 = vpop.xlane.xlu1 %834 }
 0x729   :  { %v838_v4 = vmul.f32 1.442695, %v836_v1  ;;  %v837_v5 = vsub.f32 %v829_v56, %v835_v3 }
 0x72b   :  { %3570 = vpow2.f32 %v838_v4  ;;  %v840_v7 = vmul.f32 1.442695, %v837_v5 }
 0x72d   :  { %3572 = vpow2.f32 %v840_v7 }
 0x72e   :  { %3574 = vpow2.f32 %v623_v14 }
 0x72f   :  { %3576 = vpow2.f32 %v625_v16  ;;  %v1169_v16 = vld [vmem:[%s4364_s8 + $0x10] sm:$0xff] }
 0x730   :  { %3383 = vmatprep.subr.mxu0 %v1169_v16 }
 0x731   :  { %3384 = vmatpush3.msra.mxu0 %v1169_v16 }
 0x738   :  { %v3571_v8 = vpop.eup %3570 }
 0x739   :  { %v842_v10 = vsel %vm408_vm4, %v3571_v8, 0.0 }
 0x73a   :  { %v3573_v11 = vpop.eup %3572  ;;  %843 = vadd.xlane.f32.xlu0 %v842_v10 }
 0x73b   :  { %v845_v12 = vsel %vm408_vm4, %v3573_v11, 0.0  ;;  %v3575_v17 = vpop.eup %3574 }
 0x73c   :  { %846 = vadd.xlane.f32.xlu1 %v845_v12  ;;  %v627_v18 = vsel %vm408_vm4, %v3575_v17, 0.0  ;;  %v3577_v19 = vpop.eup %3576 }
 0x73d   :  { %v630_v20 = vsel %vm408_vm4, %v3577_v19, 0.0 }
 0x74d   :  { %637 = vrot.lane.b32.xlu1 %v3876_v2, %s3668_s29 }
 0x750   :  { %639 = vrot.lane.b32.xlu0 %v3874_v0, %s3668_s29 }
 0x751   :  { %854 = vrot.lane.b32.xlu1 %v3874_v0, %s4391_s30 }
 0x76f   :  { %628 = vadd.xlane.f32.xlu0 %v627_v18  ;;  %v1167_v18 = vld [vmem:[%s4364_s8] sm:$0xff] }
 0x775   :  { %631 = vadd.xlane.f32.xlu1 %v630_v20 }
 0x785   :  { %852 = vrot.lane.b32.xlu0 %v3876_v2, %s4391_s30 }
 0x786   :  { %956 = vrot.lane.b32.xlu1 %v3874_v0, %s4389_s0 }
 0x789   :  { %954 = vrot.lane.b32.xlu0 %v3876_v2, %s4389_s0 }
 0x78a   :  { %950 = vrot.lane.b32.xlu1 %v3876_v2, %s4387_s25 }
 0x78d   :  { %952 = vrot.lane.b32.xlu0 %v3874_v0, %s4387_s25 }
 0x7c3   :  { %v844_v21 = vpop.xlane.xlu0 %843 }
 0x7c5   :  { %v847_v22 = vpop.xlane.xlu1 %846 }
 0x7c7   :  { %v640_v23 = vpop.permute.xlu0 %639 }
 0x7c8   :  { %3346 = vmatprep.subr.mxu1 %v640_v23 }
 0x7c9   :  { %3347 = vmatpush3.msra.mxu1 %v640_v23  ;;  %v638_v24 = vpop.permute.xlu1 %637 }
 0x7ca   :  { %3348 = vmatprep.subr.mxu1 %v638_v24 }
 0x7cb   :  { %3349 = vmatpush3.msra.mxu1 %v638_v24 }
 0x7cd   :  { %v855_v25 = vpop.permute.xlu1 %854 }
 0x7ce   :  { %3360 = vmatprep.subr.mxu1 %v855_v25 }
 0x7f8   :  { %v629_v26 = vpop.xlane.xlu0 %628 }
 0x7f9   :  { %3578 = vrcp.f32 %v629_v26 }
 0x7fa   :  { %3580 = vrcp.f32 %v844_v21 }
 0x7fc   :  { %v853_v35 = vpop.permute.xlu0 %852 }
 0x7fe   :  { %v632_v27 = vpop.xlane.xlu1 %631 }
 0x7ff   :  { %3582 = vrcp.f32 %v632_v27 }
 0x800   :  { %3584 = vrcp.f32 %v847_v22  ;;  %v955_v39 = vpop.permute.xlu0 %954 }
 0x802   :  { %v957_v32 = vpop.permute.xlu1 %956 }
 0x804   :  { %v953_v40 = vpop.permute.xlu0 %952 }
 0x806   :  { %v3579_v28 = vpop.eup %3578  ;;  %v951_v38 = vpop.permute.xlu1 %950 }
 0x807   :  { %v635_v29 = vmul.f32 %v3579_v28, %v3575_v17  ;;  %v3581_v30 = vpop.eup %3580  ;;  %v1168_v17 = vld [vmem:[%s4364_s8 + $0x8] sm:$0xff] }
 0x808   :  { %v850_v36 = vmul.f32 %v3581_v30, %v3571_v8  ;;  %3385 = vmatprep.subr.mxu0 %v1168_v17 }
 0x809   :  { %3350 = vmatprep.mubr.msk.f32.mxu1 %vm408_vm4, %v635_v29  ;;  %3386 = vmatpush3.msra.mxu0 %v1168_v17 }
 0x80a   :  { %3387 = vmatprep.subr.mxu0 %v1167_v18 }
 0x80b   :  { %3388 = vmatpush3.msra.mxu0 %v1167_v18 }
 0x80c   :  { %v3583_v31 = vpop.eup %3582 }
 0x80d   :  { %v636_v33 = vmul.f32 %v3583_v31, %v3577_v19  ;;  %v3585_v34 = vpop.eup %3584 }
 0x80e   :  { %v851_v37 = vmul.f32 %v3585_v34, %v3573_v11 }
 0x80f   :  { %3351 = vmatmul.mubr.msk.f32.vlgmr.msra.gmra.mxu1 %vm408_vm4, %v636_v33 }
 0x810   :  { %3361 = vmatpush3.msra.mxu1 %v855_v25  ;;  %3364 = vmatprep.mubr.msk.f32.mxu1 %vm408_vm4, %v850_v36  ;;  %v3051_v25 = vld [vmem:[%s4365_s9] ss:$0 sm:$0xff] }
 0x811   :  { %3362 = vmatprep.subr.mxu1 %v853_v35 }
 0x812   :  { %3363 = vmatpush3.msra.mxu1 %v853_v35 }
 0x813   :  { %3367 = vmatprep.subr.msk.mxu1 %vm320_vm3, %v957_v32  ;;  %3365 = vmatmul.mubr.msk.f32.vlgmr.msra.gmra.mxu1 %vm408_vm4, %v851_v37 }
 0x814   :  { %3368 = vmatpush3.xpose.msk.msra.mxu1 %vm320_vm3, %v957_v32  ;;  %3371 = vmatprep.mubr.msk.f32.mxu1 %vm320_vm3, %v951_v38 }
 0x815   :  { %3369 = vmatprep.subr.msk.mxu1 %vm320_vm3, %v955_v39 }
 0x818   :  { %3370 = vmatpush3.xpose.msk.msra.mxu1 %vm320_vm3, %v955_v39 }
 0x81b   :  { %3372 = vmatmul.mubr.msk.f32.vlgmr.msra.gmra.mxu1 %vm320_vm3, %v953_v40 }
 0x8cf   :  { %v3352_v41 = vpop.f32.mrf.mxu1 }
 0x8d1   :  { %v715_v42 = vpop.f32.mrf.mxu1 }
 0x8d3   :  { %v3366_v43 = vpop.f32.mrf.mxu1 }
 0x8d5   :  { %v930_v44 = vpop.f32.mrf.mxu1 }
 0x8db   :  { %v3373_v45 = vpop.f32.mrf.mxu1 }
 0x8dc   :  { %v1042_v46 = vmul.f32 0.35355338, %v3373_v45  ;;  %v1305_v45 = vld [vmem:[%s4366_s12] sm:$0xff] }
 0x8dd   :  { %v1032_v47 = vpop.f32.mrf.mxu1 }
 0x8de   :  { %v1041_v48 = vmul.f32 0.35355338, %v1032_v47  ;;  %v1044_v49 = vadd.f32 %v1042_v46, %v3893_v6 }
 0x8e0   :  { %v1048_v50 = vsel %vm408_vm4, %v1044_v49, -inf  ;;  %v1043_v51 = vadd.f32 %v1041_v48, %v3898_v9 }
 0x8e1   :  { %1049 = vmax.xlane.f32.xlu0 %v1048_v50 }
 0x8e2   :  { %v1045_v52 = vsel %vm408_vm4, %v1043_v51, -inf }
 0x8e3   :  { %1046 = vmax.xlane.f32.xlu1 %v1045_v52 }
 0x96a   :  { %v1050_v53 = vpop.xlane.xlu0 %1049 }
 0x96b   :  { %v1052_v54 = vsub.f32 %v1044_v49, %v1050_v53  ;;  %v3054_v53 = vld [vmem:[%s4367_s10] ss:$0 sm:$0xff] }
 0x96c   :  { %v1047_v55 = vpop.xlane.xlu1 %1046 }
 0x96d   :  { %v1055_v56 = vmul.f32 1.442695, %v1052_v54  ;;  %v1051_v57 = vsub.f32 %v1043_v51, %v1047_v55 }
 0x96f   :  { %3586 = vpow2.f32 %v1055_v56  ;;  %v1053_v58 = vmul.f32 1.442695, %v1051_v57 }
 0x971   :  { %3588 = vpow2.f32 %v1053_v58  ;;  %v3055_v58 = vld [vmem:[%s4368_s11] ss:$0 sm:$0xff] }
 0x97c   :  { %v3587_v60 = vpop.eup %3586 }
 0x97d   :  { %v1060_v62 = vsel %vm408_vm4, %v3587_v60, 0.0 }
 0x97e   :  { %v3589_v63 = vpop.eup %3588  ;;  %1061 = vadd.xlane.f32.xlu1 %v1060_v62 }
 0x97f   :  { %v1057_v1 = vsel %vm408_vm4, %v3589_v63, 0.0 }
 0x980   :  { %1058 = vadd.xlane.f32.xlu0 %v1057_v1  ;;  %v1422_v1 = vld [vmem:[%s4369_s14 + $0x38] sm:$0xff] }
 0x981   :  { %3403 = vmatprep.subr.mxu0 %v1422_v1 }
 0x98f   :  { %1067 = vrot.lane.b32.xlu1 %v3876_v2, %s4385_s21 }
 0x993   :  { %726 = vrot.lane.b32.xlu1 %v715_v42, %s4383_s2 }
 0x996   :  { %1069 = vrot.lane.b32.xlu0 %v3874_v0, %s4385_s21 }
 0x997   :  { %941 = vrot.lane.b32.xlu1 %v930_v44, %s4381_s23  ;;  %v1306_v44 = vld [vmem:[%s4366_s12 + $0x8] sm:$0xff] }
 0x99a   :  { %728 = vrot.lane.b32.xlu0 %v3352_v41, %s4383_s2 }
 0x99e   :  { %943 = vrot.lane.b32.xlu0 %v3366_v43, %s4381_s23  ;;  %v1307_v43 = vld [vmem:[%s4366_s12 + $0x10] sm:$0xff] }
 0xa07   :  { %v1062_v3 = vpop.xlane.xlu1 %1061 }
 0xa08   :  { %3590 = vrcp.f32 %v1062_v3  ;;  %v1421_v3 = vld [vmem:[%s4369_s14 + $0x30] sm:$0xff] }
 0xa09   :  { %v1059_v4 = vpop.xlane.xlu0 %1058 }
 0xa0a   :  { %3592 = vrcp.f32 %v1059_v4  ;;  %v1420_v4 = vld [vmem:[%s4369_s14 + $0x28] sm:$0xff] }
 0xa0b   :  { %v1068_v5 = vpop.permute.xlu1 %1067 }
 0xa0d   :  { %v1070_v7 = vpop.permute.xlu0 %1069 }
 0xa0e   :  { %3374 = vmatprep.subr.mxu1 %v1070_v7 }
 0xa0f   :  { %3375 = vmatpush3.msra.mxu1 %v1070_v7  ;;  %v727_v2 = vpop.permute.xlu1 %726  ;;  %v1418_v7 = vld [vmem:[%s4369_s14 + $0x18] sm:$0xff] }
 0xa10   :  { %733 = vst.msk [vmem:[#allocation2] sm:$0xff] %vm732_vm5, %v727_v2  ;;  %3376 = vmatprep.subr.mxu1 %v1068_v5  ;;  %v1417_v2 = vld [vmem:[%s4369_s14 + $0x10] sm:$0xff] }
 0xa11   :  { %v729_v0 = vpop.permute.xlu0 %728  ;;  %3377 = vmatpush3.msra.mxu1 %v1068_v5  ;;  %v1419_v5 = vld [vmem:[%s4369_s14 + $0x20] sm:$0xff] }
 0xa12   :  { %734 = vst.msk [vmem:[#allocation2 + $0x8] sm:$0xff] %vm732_vm5, %v729_v0  ;;  %v1416_v0 = vld [vmem:[%s4369_s14 + $0x8] sm:$0xff] }
 0xa13   :  { %v942_v8 = vpop.permute.xlu1 %941 }
 0xa14   :  { %948 = vst.msk [vmem:[#allocation2] sm:$0xff] %vm947_vm6, %v942_v8  ;;  %v1415_v8 = vld [vmem:[%s4369_s14] sm:$0xff] }
 0xa15   :  { %v944_v10 = vpop.permute.xlu0 %943  ;;  %v3591_v11 = vpop.eup %3590 }
 0xa16   :  { %949 = vst.msk [vmem:[#allocation2 + $0x8] sm:$0xff] %vm947_vm6, %v944_v10  ;;  %v1066_v14 = vmul.f32 %v3591_v11, %v3587_v60  ;;  %v3056_v10 = vld [vmem:[%s4370_s13] ss:$0 sm:$0xff] }
 0xa17   :  { %v3593_v12 = vpop.eup %3592 }
 0xa18   :  { %v1065_v13 = vmul.f32 %v3593_v12, %v3589_v63 }
 0xa1a   :  { %3378 = vmatprep.mubr.msk.f32.mxu1 %vm408_vm4, %v1065_v13 }
 0xa1b   :  { %3379 = vmatmul.mubr.msk.f32.vlgmr.msra.gmra.mxu1 %vm408_vm4, %v1066_v14 }
 0xadb   :  { %v3380_v19 = vpop.f32.mrf.mxu1 }
 0xadc   :  { %1158 = vrot.lane.b32.xlu0 %v3380_v19, %s4393_s24 }
 0xadd   :  { %v1145_v20 = vpop.f32.mrf.mxu1 }
 0xade   :  { %1156 = vrot.lane.b32.xlu1 %v1145_v20, %s4393_s24 }
 0xb4e   :  { %v1159_v21 = vpop.permute.xlu0 %1158 }
 0xb4f   :  { %1164 = vst.msk [vmem:[#allocation2 + $0x8] sm:$0xff] %vm1162_vm7, %v1159_v21 }
 0xb50   :  { %v1157_v22 = vpop.permute.xlu1 %1156 }
 0xb51   :  { %1163 = vst.msk [vmem:[#allocation2] sm:$0xff] %vm1162_vm7, %v1157_v22 }
 0xb56   :  { %v1166_v24 = vld [vmem:[#allocation2 + $0x8] sm:$0xff] }
 0xb58   :  { %v1165_v23 = vld [vmem:[#allocation2] sm:$0xff] }
 0xb59   :  { %3389 = vmatprep.mubr.msk.f32.mxu0 %vm176_vm2, %v1165_v23 }
 0xb5a   :  { %3390 = vmatmul.mubr.msk.f32.vlgmr.msra.gmra.mxu0 %vm176_vm2, %v1166_v24 }
 0xb5b   :  { %3404 = vmatpush3.msra.mxu0 %v1422_v1 }
 0xb5c   :  { %3405 = vmatprep.subr.mxu0 %v1421_v3 }
 0xb5d   :  { %3406 = vmatpush3.msra.mxu0 %v1421_v3 }
 0xb5e   :  { %3407 = vmatprep.subr.mxu0 %v1420_v4 }
 0xb5f   :  { %3408 = vmatpush3.msra.mxu0 %v1420_v4 }
 0xb60   :  { %3409 = vmatprep.subr.mxu0 %v1419_v5 }
 0xb61   :  { %3410 = vmatpush3.msra.mxu0 %v1419_v5 }
 0xb62   :  { %3411 = vmatprep.subr.mxu0 %v1418_v7 }
 0xb63   :  { %3412 = vmatpush3.msra.mxu0 %v1418_v7  ;;  %v3063_v7 = vld [vmem:[%s4373_s17] ss:$0 sm:$0xff] }
 0xb64   :  { %3413 = vmatprep.subr.mxu0 %v1417_v2 }
 0xb65   :  { %3414 = vmatpush3.msra.mxu0 %v1417_v2 }
 0xb66   :  { %3415 = vmatprep.subr.mxu0 %v1416_v0 }
 0xb67   :  { %3416 = vmatpush3.msra.mxu0 %v1416_v0 }
 0xb68   :  { %3417 = vmatprep.subr.mxu0 %v1415_v8 }
 0xb69   :  { %3418 = vmatpush3.msra.mxu0 %v1415_v8 }
 0xc1a   :  { %v3391_v26 = vpop.f32.mrf.mxu0 }
 0xc1b   :  { %v1256_v27 = vadd.f32 %v3391_v26, %v3051_v25 }
 0xc1c   :  { %v1250_v28 = vpop.f32.mrf.mxu0 }
 0xc1d   :  { %v1251_v29 = vadd.f32 %v3051_v25, %v1250_v28  ;;  %v1260_v30 = vadd.f32 %v1256_v27, %v3867_v61 }
 0xc1f   :  { %v1266_v31 = vsel %vm176_vm2, %v1260_v30, 0.0  ;;  %v1259_v32 = vadd.f32 %v1251_v29, %v3863_v59  ;;  %v1308_v59 = vld [vmem:[%s4366_s12 + $0x18] sm:$0xff] }
 0xc20   :  { %1267 = vadd.xlane.f32.xlu0 %v1266_v31  ;;  %3392 = vmatprep.subr.mxu1 %v1308_v59 }
 0xc21   :  { %v1263_v33 = vsel %vm176_vm2, %v1259_v32, 0.0  ;;  %3393 = vmatpush3.msra.mxu1 %v1308_v59 }
 0xc22   :  { %1264 = vadd.xlane.f32.xlu1 %v1263_v33  ;;  %3394 = vmatprep.subr.mxu1 %v1307_v43  ;;  %v3059_v33 = vld [vmem:[%s4371_s15] ss:$0 sm:$0xff] }
 0xc23   :  { %3395 = vmatpush3.msra.mxu1 %v1307_v43 }
 0xc24   :  { %3396 = vmatprep.subr.mxu1 %v1306_v44 }
 0xc25   :  { %3397 = vmatpush3.msra.mxu1 %v1306_v44 }
 0xc26   :  { %3398 = vmatprep.subr.mxu1 %v1305_v45 }
 0xc27   :  { %3399 = vmatpush3.msra.mxu1 %v1305_v45 }
 0xca9   :  { %v1268_v34 = vpop.xlane.xlu0 %1267 }
 0xcaa   :  { %v1270_v35 = vmul.f32 0.03125, %v1268_v34 }
 0xcab   :  { %v1265_v36 = vpop.xlane.xlu1 %1264 }
 0xcac   :  { %v1272_v37 = vsub.f32 %v1260_v30, %v1270_v35  ;;  %v1269_v38 = vmul.f32 0.03125, %v1265_v36 }
 0xcae   :  { %v1271_v39 = vsub.f32 %v1259_v32, %v1269_v38  ;;  %v1274_v40 = vmul.f32 %v1272_v37, %v1272_v37 }
 0xcb0   :  { %v1278_v41 = vsel %vm176_vm2, %v1274_v40, 0.0  ;;  %v1273_v42 = vmul.f32 %v1271_v39, %v1271_v39 }
 0xcb1   :  { %1279 = vadd.xlane.f32.xlu1 %v1278_v41 }
 0xcb2   :  { %v1275_v61 = vsel %vm176_vm2, %v1273_v42, 0.0 }
 0xcb3   :  { %1276 = vadd.xlane.f32.xlu0 %v1275_v61 }
 0xd3a   :  { %v1280_v46 = vpop.xlane.xlu1 %1279 }
 0xd3b   :  { %v1282_v47 = vmul.f32 0.03125, %v1280_v46 }
 0xd3c   :  { %v1277_v48 = vpop.xlane.xlu0 %1276 }
 0xd3d   :  { %v1284_v49 = vadd.f32 1e-12, %v1282_v47  ;;  %v1281_v50 = vmul.f32 0.03125, %v1277_v48 }
 0xd3f   :  { %3594 = vrsqrt.f32 %v1284_v49  ;;  %v1283_v51 = vadd.f32 1e-12, %v1281_v50  ;;  %v3067_v50 = vld [vmem:[%s4403_s22 + $0x38] sm:$0xff] }
 0xd40   :  { %3422 = vmatprep.subr.mxu1 %v3067_v50 }
 0xd41   :  { %3596 = vrsqrt.f32 %v1283_v51  ;;  %v3066_v51 = vld [vmem:[%s4403_s22 + $0x30] sm:$0xff] }
 0xd4c   :  { %v3595_v52 = vpop.eup %3594 }
 0xd4d   :  { %v1288_v54 = vmul.f32 %v3595_v52, %v1272_v37  ;;  %v3065_v52 = vld [vmem:[%s4403_s22 + $0x28] sm:$0xff] }
 0xd4e   :  { %v3597_v55 = vpop.eup %3596 }
 0xd4f   :  { %v1287_v56 = vmul.f32 %v3597_v55, %v1271_v39  ;;  %v1296_v57 = vmul.f32 %v3054_v53, %v1288_v54 }
 0xd51   :  { %v1295_v60 = vmul.f32 %v3054_v53, %v1287_v56  ;;  %v4047_v63 = vadd.f32 %v3055_v58, %v1296_v57  ;;  %v3064_v53 = vld [vmem:[%s4403_s22 + $0x20] sm:$0xff] }
 0xd53   :  { %v4045_v62 = vadd.f32 %v3055_v58, %v1295_v60 }
 0xd55   :  { %3400 = vmatprep.mubr.msk.f32.mxu1 %vm176_vm2, %v4045_v62 }
 0xd56   :  { %3401 = vmatmul.mubr.msk.f32.vlgmr.msra.gmra.mxu1 %vm176_vm2, %v4047_v63 }
 0xd57   :  { %3423 = vmatpush3.msra.mxu1 %v3067_v50 }
 0xd58   :  { %3424 = vmatprep.subr.mxu1 %v3066_v51 }
 0xd59   :  { %3425 = vmatpush3.msra.mxu1 %v3066_v51 }
 0xd5a   :  { %3426 = vmatprep.subr.mxu1 %v3065_v52 }
 0xd5b   :  { %3427 = vmatpush3.msra.mxu1 %v3065_v52 }
 0xd5c   :  { %3428 = vmatprep.subr.mxu1 %v3064_v53 }
 0xd5d   :  { %3429 = vmatpush3.msra.mxu1 %v3064_v53 }
 0xe16   :  { %v3402_v11 = vpop.f32.mrf.mxu1 }
 0xe17   :  { %v1394_v12 = vadd.f32 %v3402_v11, %v3056_v10 }
 0xe18   :  { %v1388_v13 = vpop.f32.mrf.mxu1 }
 0xe19   :  { %v1400_v14 = vmul.f32 0.044715, %v1394_v12  ;;  %v1389_v15 = vadd.f32 %v3056_v10, %v1388_v13  ;;  %v1398_v30 = vmul.f32 0.5, %v1394_v12  ;;  %v3069_v10 = vld [vmem:[%s4362_s7 + $0x1] ss:$0 sm:$0xff]  ;;  %s4411_s7 = smov 24  }
 0xe1b   :  { %v1402_v16 = vmul.f32 %v1400_v14, %v1394_v12  ;;  %v1399_v17 = vmul.f32 0.044715, %v1389_v15  ;;  %v1397_v28 = vmul.f32 0.5, %v1389_v15 }
 0xe1d   :  { %v1404_v18 = vmul.f32 %v1402_v16, %v1394_v12  ;;  %v1401_v19 = vmul.f32 %v1399_v17, %v1389_v15 }
 0xe1f   :  { %v1406_v20 = vadd.f32 %v1404_v18, %v1394_v12  ;;  %v1403_v21 = vmul.f32 %v1401_v19, %v1389_v15 }
 0xe21   :  { %v1408_v22 = vmul.f32 0.7978846, %v1406_v20  ;;  %v1405_v23 = vadd.f32 %v1403_v21, %v1389_v15 }
 0xe23   :  { %3598 = vtanh.f32 %v1408_v22  ;;  %v1407_v24 = vmul.f32 0.7978846, %v1405_v23 }
 0xe25   :  { %3600 = vtanh.f32 %v1407_v24 }
 0xe30   :  { %v3599_v25 = vpop.eup %3598 }
 0xe31   :  { %v1412_v27 = vadd.f32 1.0, %v3599_v25 }
 0xe32   :  { %v3601_v26 = vpop.eup %3600 }
 0xe33   :  { %v1411_v29 = vadd.f32 1.0, %v3601_v26  ;;  %v1414_v32 = vmul.f32 %v1412_v27, %v1398_v30 }
 0xe35   :  { %v1413_v31 = vmul.f32 %v1411_v29, %v1397_v28 }
 0xe37   :  { %3419 = vmatprep.mubr.msk.f32.mxu0 %vm1430_vm8, %v1413_v31 }
 0xe38   :  { %3420 = vmatmul.mubr.msk.f32.vlgmr.msra.gmra.mxu0 %vm1430_vm8, %v1414_v32 }
 0xef8   :  { %v3421_v34 = vpop.f32.mrf.mxu0 }
 0xef9   :  { %v1509_v35 = vadd.f32 %v3421_v34, %v3059_v33 }
 0xefa   :  { %v1503_v36 = vpop.f32.mrf.mxu0 }
 0xefb   :  { %v1504_v37 = vadd.f32 %v3059_v33, %v1503_v36  ;;  %v1513_v38 = vadd.f32 %v1509_v35, %v4047_v63  ;;  %v3062_v63 = vld [vmem:[%s4372_s16] ss:$0 sm:$0xff] }
 0xefd   :  { %v1519_v39 = vsel %vm176_vm2, %v1513_v38, 0.0  ;;  %v1512_v40 = vadd.f32 %v1504_v37, %v4045_v62 }
 0xefe   :  { %1520 = vadd.xlane.f32.xlu1 %v1519_v39 }
 0xeff   :  { %v1516_v41 = vsel %vm176_vm2, %v1512_v40, 0.0 }
 0xf00   :  { %1517 = vadd.xlane.f32.xlu0 %v1516_v41 }
 0xf87   :  { %v1521_v42 = vpop.xlane.xlu1 %1520 }
 0xf88   :  { %v1523_v61 = vmul.f32 0.03125, %v1521_v42 }
 0xf89   :  { %v1518_v59 = vpop.xlane.xlu0 %1517 }
 0xf8a   :  { %v1525_v43 = vsub.f32 %v1513_v38, %v1523_v61  ;;  %v1522_v44 = vmul.f32 0.03125, %v1518_v59 }
 0xf8c   :  { %v1524_v45 = vsub.f32 %v1512_v40, %v1522_v44  ;;  %v1527_v46 = vmul.f32 %v1525_v43, %v1525_v43 }
 0xf8e   :  { %v1531_v47 = vsel %vm176_vm2, %v1527_v46, 0.0  ;;  %v1526_v48 = vmul.f32 %v1524_v45, %v1524_v45 }
 0xf8f   :  { %1532 = vadd.xlane.f32.xlu1 %v1531_v47 }
 0xf90   :  { %v1528_v49 = vsel %vm176_vm2, %v1526_v48, 0.0 }
 0xf91   :  { %1529 = vadd.xlane.f32.xlu0 %v1528_v49 }
0x1018   :  { %v1533_v54 = vpop.xlane.xlu1 %1532 }
0x1019   :  { %v1535_v55 = vmul.f32 0.03125, %v1533_v54 }
0x101a   :  { %v1530_v56 = vpop.xlane.xlu0 %1529 }
0x101b   :  { %v1537_v57 = vadd.f32 1e-12, %v1535_v55  ;;  %v1534_v58 = vmul.f32 0.03125, %v1530_v56 }
0x101d   :  { %3602 = vrsqrt.f32 %v1537_v57  ;;  %v1536_v60 = vadd.f32 1e-12, %v1534_v58 }
0x101f   :  { %3604 = vrsqrt.f32 %v1536_v60 }
0x102a   :  { %v3603_v62 = vpop.eup %3602 }
0x102b   :  { %v1541_v1 = vmul.f32 %v3603_v62, %v1525_v43 }
0x102c   :  { %v3605_v3 = vpop.eup %3604 }
0x102d   :  { %v1540_v4 = vmul.f32 %v3605_v3, %v1524_v45  ;;  %v1549_v5 = vmul.f32 %v3062_v63, %v1541_v1 }
0x102f   :  { %v1548_v2 = vmul.f32 %v3062_v63, %v1540_v4  ;;  %v4111_v8 = vadd.f32 %v3063_v7, %v1549_v5 }
0x1031   :  { %v4109_v0 = vadd.f32 %v3063_v7, %v1548_v2 }
0x1033   :  { %3430 = vmatprep.mubr.msk.f32.mxu1 %vm176_vm2, %v4109_v0 }
0x1034   :  { %3431 = vmatmul.mubr.msk.f32.vlgmr.msra.gmra.mxu1 %vm176_vm2, %v4111_v8 }
0x10f4   :  { %v3432_v11 = vpop.f32.mrf.mxu1 }
0x10f5   :  { %v4120_v12 = vadd.f32 %v3432_v11, %v3069_v10 }
0x10f6   :  { %v1643_v13 = vpop.f32.mrf.mxu1 }
0x10f7   :  { %v4122_v14 = vadd.f32 %v3069_v10, %v1643_v13  ;;  %1656 = vrot.lane.b32.xlu0 %v4120_v12, %s3662_s5 }
0x10f9   :  { %1654 = vrot.lane.b32.xlu1 %v4122_v14, %s3662_s5  ;;  %3437 = vmatprep.mubr.msk.f32.mxu1 %vm320_vm3, %v4122_v14 }
0x10fb   :  { %1860 = vrot.lane.b32.xlu0 %v4122_v14, %s3665_s27 }
0x10fd   :  { %1862 = vrot.lane.b32.xlu1 %v4120_v12, %s3665_s27  ;;  %s4406_s27 = smov 72  }
0x10ff   :  { %1858 = vrot.lane.b32.xlu0 %v4120_v12, %s3664_s26 }
0x1101   :  { %1856 = vrot.lane.b32.xlu1 %v4122_v14, %s3664_s26 }
0x1169   :  { %v1657_v15 = vpop.permute.xlu0 %1656 }
0x116a   :  { %3433 = vmatprep.subr.msk.mxu1 %vm320_vm3, %v1657_v15 }
0x116b   :  { %3434 = vmatpush3.xpose.msk.msra.mxu1 %vm320_vm3, %v1657_v15  ;;  %v1655_v16 = vpop.permute.xlu1 %1654 }
0x116c   :  { %3435 = vmatprep.subr.msk.mxu1 %vm320_vm3, %v1655_v16 }
0x116d   :  { %v1861_v18 = vpop.permute.xlu0 %1860 }
0x116f   :  { %3436 = vmatpush3.xpose.msk.msra.mxu1 %vm320_vm3, %v1655_v16  ;;  %v1863_v17 = vpop.permute.xlu1 %1862 }
0x1170   :  { %3447 = vmatprep.subr.msk.mxu1 %vm320_vm3, %v1863_v17 }
0x1171   :  { %v1859_v20 = vpop.permute.xlu0 %1858 }
0x1172   :  { %3438 = vmatmul.mubr.msk.f32.vlgmr.msra.gmra.mxu1 %vm320_vm3, %v4120_v12 }
0x1173   :  { %v1857_v19 = vpop.permute.xlu1 %1856  ;;  %3448 = vmatpush3.xpose.msk.msra.mxu1 %vm320_vm3, %v1863_v17 }
0x1174   :  { %3449 = vmatprep.subr.msk.mxu1 %vm320_vm3, %v1861_v18  ;;  %3451 = vmatprep.mubr.msk.f32.mxu1 %vm320_vm3, %v1857_v19 }
0x1177   :  { %3450 = vmatpush3.xpose.msk.msra.mxu1 %vm320_vm3, %v1861_v18 }
0x117a   :  { %3452 = vmatmul.mubr.msk.f32.vlgmr.msra.gmra.mxu1 %vm320_vm3, %v1859_v20 }
0x1232   :  { %v3439_v21 = vpop.f32.mrf.mxu1 }
0x1233   :  { %v1742_v22 = vmul.f32 0.35355338, %v3439_v21 }
0x1234   :  { %v1732_v23 = vpop.f32.mrf.mxu1 }
0x1235   :  { %v1741_v24 = vmul.f32 0.35355338, %v1732_v23  ;;  %v1744_v25 = vadd.f32 %v1742_v22, %v3893_v6 }
0x1237   :  { %v1748_v26 = vsel %vm408_vm4, %v1744_v25, -inf  ;;  %v1743_v27 = vadd.f32 %v1741_v24, %v3898_v9 }
0x1238   :  { %1749 = vmax.xlane.f32.xlu0 %v1748_v26 }
0x1239   :  { %v1745_v28 = vsel %vm408_vm4, %v1743_v27, -inf }
0x123a   :  { %v3453_v29 = vpop.f32.mrf.mxu1  ;;  %1746 = vmax.xlane.f32.xlu1 %v1745_v28  ;;  %v3659_v28 = vld [vmem:[%s4363_s1] sm:$0xff] }
0x123b   :  { %v1948_v30 = vmul.f32 0.35355338, %v3453_v29 }
0x123c   :  { %v1938_v31 = vpop.f32.mrf.mxu1 }
0x123d   :  { %v1947_v32 = vmul.f32 0.35355338, %v1938_v31  ;;  %v1950_v33 = vadd.f32 %v1948_v30, %v3893_v6 }
0x123f   :  { %v1954_v34 = vsel %vm408_vm4, %v1950_v33, -inf  ;;  %v1949_v35 = vadd.f32 %v1947_v32, %v3898_v9 }
0x1240   :  { %1955 = vmax.xlane.f32.xlu1 %v1954_v34 }
0x1241   :  { %v1951_v36 = vsel %vm408_vm4, %v1949_v35, -inf }
0x1242   :  { %1952 = vmax.xlane.f32.xlu0 %v1951_v36 }
0x1251   :  { %1767 = vrot.lane.b32.xlu1 %v4122_v14, %s3663_s6 }
0x1255   :  { %1975 = vrot.lane.b32.xlu1 %v4120_v12, %s3668_s29 }
0x1258   :  { %1769 = vrot.lane.b32.xlu0 %v4120_v12, %s3663_s6 }
0x12c1   :  { %v1750_v37 = vpop.xlane.xlu0 %1749 }
0x12c2   :  { %v1752_v38 = vsub.f32 %v1744_v25, %v1750_v37  ;;  %v3658_v25 = vld [vmem:[%s4363_s1 + $0x8] sm:$0xff]  ;;  %s4405_s1 = smov 48  }
0x12c3   :  { %v1747_v6 = vpop.xlane.xlu1 %1746 }
0x12c4   :  { %v1755_v39 = vmul.f32 1.442695, %v1752_v38  ;;  %v1751_v40 = vsub.f32 %v1743_v27, %v1747_v6 }
0x12c6   :  { %3606 = vpow2.f32 %v1755_v39  ;;  %v1753_v9 = vmul.f32 1.442695, %v1751_v40 }
0x12c8   :  { %3608 = vpow2.f32 %v1753_v9 }
0x12c9   :  { %v1956_v41 = vpop.xlane.xlu1 %1955 }
0x12ca   :  { %v1958_v42 = vsub.f32 %v1950_v33, %v1956_v41 }
0x12cb   :  { %v1953_v61 = vpop.xlane.xlu0 %1952 }
0x12cc   :  { %v1961_v59 = vmul.f32 1.442695, %v1958_v42  ;;  %v1957_v43 = vsub.f32 %v1949_v35, %v1953_v61 }
0x12cd   :  { %v1768_v44 = vpop.permute.xlu1 %1767 }
0x12ce   :  { %3610 = vpow2.f32 %v1961_v59  ;;  %v1959_v45 = vmul.f32 1.442695, %v1957_v43 }
0x12cf   :  { %v1770_v46 = vpop.permute.xlu0 %1769 }
0x12d0   :  { %3612 = vpow2.f32 %v1959_v45  ;;  %3440 = vmatprep.subr.mxu0 %v1770_v46 }
0x12d1   :  { %3441 = vmatpush3.msra.mxu0 %v1770_v46  ;;  %v1976_v48 = vpop.permute.xlu1 %1975 }
0x12d2   :  { %3442 = vmatprep.subr.mxu0 %v1768_v44 }
0x12d3   :  { %v3607_v47 = vpop.eup %3606  ;;  %3443 = vmatpush3.msra.mxu0 %v1768_v44 }
0x12d4   :  { %3454 = vmatprep.subr.mxu0 %v1976_v48  ;;  %v1760_v49 = vsel %vm408_vm4, %v3607_v47, 0.0 }
0x12d5   :  { %v3609_v50 = vpop.eup %3608  ;;  %1761 = vadd.xlane.f32.xlu1 %v1760_v49 }
0x12d6   :  { %v1757_v51 = vsel %vm408_vm4, %v3609_v50, 0.0 }
0x12d7   :  { %1758 = vadd.xlane.f32.xlu0 %v1757_v51 }
0x12db   :  { %v3611_v52 = vpop.eup %3610 }
0x12dc   :  { %v1966_v53 = vsel %vm408_vm4, %v3611_v52, 0.0 }
0x12dd   :  { %v3613_v54 = vpop.eup %3612  ;;  %1967 = vadd.xlane.f32.xlu1 %v1966_v53 }
0x12de   :  { %v1963_v55 = vsel %vm408_vm4, %v3613_v54, 0.0 }
0x12df   :  { %1964 = vadd.xlane.f32.xlu0 %v1963_v55 }
0x12ee   :  { %2076 = vrot.lane.b32.xlu1 %v4120_v12, %s3667_s4 }
0x12f2   :  { %2070 = vrot.lane.b32.xlu1 %v4122_v14, %s3666_s28 }
0x12f5   :  { %1973 = vrot.lane.b32.xlu0 %v4122_v14, %s3668_s29  ;;  %s4409_s29 = smov 8  }
0x12f9   :  { %2074 = vrot.lane.b32.xlu0 %v4122_v14, %s3667_s4  ;;  %s4408_s4 = smov 40  }
0x12fd   :  { %2072 = vrot.lane.b32.xlu0 %v4120_v12, %s3666_s28  ;;  %s4407_s28 = smov 104  }
0x135e   :  { %v1762_v56 = vpop.xlane.xlu1 %1761 }
0x135f   :  { %3614 = vrcp.f32 %v1762_v56 }
0x1360   :  { %v1759_v57 = vpop.xlane.xlu0 %1758 }
0x1361   :  { %3616 = vrcp.f32 %v1759_v57 }
0x1366   :  { %v1968_v58 = vpop.xlane.xlu1 %1967 }
0x1367   :  { %3618 = vrcp.f32 %v1968_v58 }
0x1368   :  { %v1965_v60 = vpop.xlane.xlu0 %1964 }
0x1369   :  { %3620 = vrcp.f32 %v1965_v60 }
0x136a   :  { %v2077_v5 = vpop.permute.xlu1 %2076 }
0x136c   :  { %v3615_v62 = vpop.eup %3614  ;;  %v1974_v4 = vpop.permute.xlu0 %1973 }
0x136d   :  { %v1766_v3 = vmul.f32 %v3615_v62, %v3607_v47 }
0x136e   :  { %v3617_v63 = vpop.eup %3616  ;;  %v2071_v13 = vpop.permute.xlu1 %2070 }
0x136f   :  { %v1765_v1 = vmul.f32 %v3617_v63, %v3609_v50 }
0x1370   :  { %v2075_v15 = vpop.permute.xlu0 %2074 }
0x1371   :  { %3444 = vmatprep.mubr.msk.f32.mxu0 %vm408_vm4, %v1765_v1 }
0x1372   :  { %3445 = vmatmul.mubr.msk.f32.vlgmr.msra.gmra.mxu0 %vm408_vm4, %v1766_v3 }
0x1373   :  { %3455 = vmatpush3.msra.mxu0 %v1976_v48 }
0x1374   :  { %3456 = vmatprep.subr.mxu0 %v1974_v4  ;;  %v3619_v7 = vpop.eup %3618  ;;  %v2073_v16 = vpop.permute.xlu0 %2072 }
0x1375   :  { %3457 = vmatpush3.msra.mxu0 %v1974_v4  ;;  %v1972_v11 = vmul.f32 %v3619_v7, %v3611_v52 }
0x1376   :  { %v3621_v2 = vpop.eup %3620  ;;  %3461 = vmatprep.subr.msk.mxu0 %vm320_vm3, %v2077_v5 }
0x1377   :  { %v1971_v10 = vmul.f32 %v3621_v2, %v3613_v54 }
0x1379   :  { %3458 = vmatprep.mubr.msk.f32.mxu0 %vm408_vm4, %v1971_v10 }
0x137a   :  { %3459 = vmatmul.mubr.msk.f32.vlgmr.msra.gmra.mxu0 %vm408_vm4, %v1972_v11 }
0x137b   :  { %3462 = vmatpush3.xpose.msk.msra.mxu0 %vm320_vm3, %v2077_v5  ;;  %3465 = vmatprep.mubr.msk.f32.mxu0 %vm320_vm3, %v2071_v13 }
0x137c   :  { %3463 = vmatprep.subr.msk.mxu0 %vm320_vm3, %v2075_v15 }
0x137f   :  { %3464 = vmatpush3.xpose.msk.msra.mxu0 %vm320_vm3, %v2075_v15 }
0x1382   :  { %3466 = vmatmul.mubr.msk.f32.vlgmr.msra.gmra.mxu0 %vm320_vm3, %v2073_v16 }
0x1432   :  { %v3446_v17 = vpop.f32.mrf.mxu0 }
0x1433   :  { %1855 = vst.msk [vmem:[#allocation2 + $0x8] sm:$0xff] %vm320_vm3, %v3446_v17 }
0x1434   :  { %v1845_v18 = vpop.f32.mrf.mxu0 }
0x1435   :  { %1854 = vst.msk [vmem:[#allocation2] sm:$0xff] %vm320_vm3, %v1845_v18 }
0x143a   :  { %v4190_v19 = vpop.f32.mrf.mxu0 }
0x143c   :  { %v4192_v20 = vpop.f32.mrf.mxu0 }
0x1442   :  { %v3467_v21 = vpop.f32.mrf.mxu0 }
0x1443   :  { %v2162_v22 = vmul.f32 0.35355338, %v3467_v21 }
0x1444   :  { %v2152_v23 = vpop.f32.mrf.mxu0 }
0x1445   :  { %v2161_v24 = vmul.f32 0.35355338, %v2152_v23  ;;  %v2164_v26 = vadd.f32 %v3658_v25, %v2162_v22  ;;  %v3099_v23 = vld [vmem:[%s4364_s8 + $0x38] sm:$0xff] }
0x1447   :  { %v2168_v27 = vsel %vm408_vm4, %v2164_v26, -inf  ;;  %v2163_v29 = vadd.f32 %v3659_v28, %v2161_v24  ;;  %v3098_v24 = vld [vmem:[%s4364_s8 + $0x30] sm:$0xff] }
0x1448   :  { %2169 = vmax.xlane.f32.xlu0 %v2168_v27 }
0x1449   :  { %v2165_v30 = vsel %vm408_vm4, %v2163_v29, -inf }
0x144a   :  { %2166 = vmax.xlane.f32.xlu1 %v2165_v30 }
0x14d1   :  { %v2170_v31 = vpop.xlane.xlu0 %2169 }
0x14d2   :  { %v2172_v32 = vsub.f32 %v2164_v26, %v2170_v31  ;;  %v3096_v26 = vld [vmem:[%s4364_s8 + $0x20] sm:$0xff] }
0x14d3   :  { %v2167_v33 = vpop.xlane.xlu1 %2166 }
0x14d4   :  { %v2175_v34 = vmul.f32 1.442695, %v2172_v32  ;;  %v2171_v35 = vsub.f32 %v2163_v29, %v2167_v33  ;;  %v3101_v33 = vld [vmem:[%s4365_s9 + $0x1] ss:$0 sm:$0xff] }
0x14d6   :  { %3622 = vpow2.f32 %v2175_v34  ;;  %v2173_v36 = vmul.f32 1.442695, %v2171_v35 }
0x14d8   :  { %3624 = vpow2.f32 %v2173_v36 }
0x14e3   :  { %v3623_v37 = vpop.eup %3622 }
0x14e4   :  { %v2180_v38 = vsel %vm408_vm4, %v3623_v37, 0.0 }
0x14e5   :  { %v3625_v6 = vpop.eup %3624  ;;  %2181 = vadd.xlane.f32.xlu1 %v2180_v38 }
0x14e6   :  { %v2177_v39 = vsel %vm408_vm4, %v3625_v6, 0.0 }
0x14e7   :  { %2178 = vadd.xlane.f32.xlu0 %v2177_v39 }
0x14f6   :  { %2187 = vrot.lane.b32.xlu1 %v4122_v14, %s4405_s1 }
0x14fa   :  { %2290 = vrot.lane.b32.xlu1 %v4120_v12, %s4406_s27 }
0x14fd   :  { %2189 = vrot.lane.b32.xlu0 %v4120_v12, %s4405_s1 }
0x14fe   :  { %2284 = vrot.lane.b32.xlu1 %v4122_v14, %s4407_s28 }
0x1501   :  { %2288 = vrot.lane.b32.xlu0 %v4122_v14, %s4406_s27 }
0x1505   :  { %2286 = vrot.lane.b32.xlu0 %v4120_v12, %s4407_s28 }
0x156e   :  { %v2182_v40 = vpop.xlane.xlu1 %2181 }
0x156f   :  { %3626 = vrcp.f32 %v2182_v40 }
0x1570   :  { %v2179_v9 = vpop.xlane.xlu0 %2178 }
0x1571   :  { %3628 = vrcp.f32 %v2179_v9 }
0x1572   :  { %v2188_v41 = vpop.permute.xlu1 %2187 }
0x1574   :  { %v2190_v42 = vpop.permute.xlu0 %2189 }
0x1575   :  { %3468 = vmatprep.subr.mxu1 %v2190_v42 }
0x1576   :  { %3469 = vmatpush3.msra.mxu1 %v2190_v42  ;;  %v2291_v61 = vpop.permute.xlu1 %2290 }
0x1577   :  { %3470 = vmatprep.subr.mxu1 %v2188_v41 }
0x1578   :  { %3471 = vmatpush3.msra.mxu1 %v2188_v41  ;;  %v2289_v47 = vpop.permute.xlu0 %2288 }
0x1579   :  { %3475 = vmatprep.subr.msk.mxu1 %vm320_vm3, %v2291_v61 }
0x157a   :  { %v2285_v46 = vpop.permute.xlu1 %2284 }
0x157c   :  { %v3627_v59 = vpop.eup %3626  ;;  %v2287_v48 = vpop.permute.xlu0 %2286 }
0x157d   :  { %v2186_v45 = vmul.f32 %v3627_v59, %v3623_v37 }
0x157e   :  { %v3629_v43 = vpop.eup %3628 }
0x157f   :  { %v2185_v44 = vmul.f32 %v3629_v43, %v3625_v6 }
0x1581   :  { %3472 = vmatprep.mubr.msk.f32.mxu1 %vm408_vm4, %v2185_v44 }
0x1582   :  { %3473 = vmatmul.mubr.msk.f32.vlgmr.msra.gmra.mxu1 %vm408_vm4, %v2186_v45 }
0x1583   :  { %3476 = vmatpush3.xpose.msk.msra.mxu1 %vm320_vm3, %v2291_v61  ;;  %3479 = vmatprep.mubr.msk.f32.mxu1 %vm320_vm3, %v2285_v46 }
0x1584   :  { %3477 = vmatprep.subr.msk.mxu1 %vm320_vm3, %v2289_v47 }
0x1587   :  { %3478 = vmatpush3.xpose.msk.msra.mxu1 %vm320_vm3, %v2289_v47  ;;  %v3110_v47 = vld [vmem:[%s4366_s12 + $0x30] sm:$0xff] }
0x158a   :  { %3480 = vmatmul.mubr.msk.f32.vlgmr.msra.gmra.mxu1 %vm320_vm3, %v2287_v48  ;;  %v3109_v48 = vld [vmem:[%s4366_s12 + $0x28] sm:$0xff] }
0x1642   :  { %v3474_v49 = vpop.f32.mrf.mxu1 }
0x1644   :  { %v2265_v50 = vpop.f32.mrf.mxu1 }
0x164a   :  { %v3481_v51 = vpop.f32.mrf.mxu1 }
0x164b   :  { %v2376_v52 = vmul.f32 0.35355338, %v3481_v51 }
0x164c   :  { %v2366_v53 = vpop.f32.mrf.mxu1 }
0x164d   :  { %v2375_v54 = vmul.f32 0.35355338, %v2366_v53  ;;  %v2378_v55 = vadd.f32 %v3658_v25, %v2376_v52  ;;  %v3097_v25 = vld [vmem:[%s4364_s8 + $0x28] sm:$0xff] }
0x164f   :  { %v2382_v56 = vsel %vm408_vm4, %v2378_v55, -inf  ;;  %v2377_v57 = vadd.f32 %v3659_v28, %v2375_v54 }
0x1650   :  { %2383 = vmax.xlane.f32.xlu0 %v2382_v56 }
0x1651   :  { %v2379_v58 = vsel %vm408_vm4, %v2377_v57, -inf }
0x1652   :  { %2380 = vmax.xlane.f32.xlu1 %v2379_v58 }
0x16d9   :  { %v2384_v60 = vpop.xlane.xlu0 %2383 }
0x16da   :  { %v2386_v62 = vsub.f32 %v2378_v55, %v2384_v60 }
0x16db   :  { %v2381_v63 = vpop.xlane.xlu1 %2380 }
0x16dc   :  { %v2389_v1 = vmul.f32 1.442695, %v2386_v62  ;;  %v2385_v3 = vsub.f32 %v2377_v57, %v2381_v63  ;;  %v3106_v57 = vld [vmem:[%s4367_s10 + $0x1] ss:$0 sm:$0xff] }
0x16de   :  { %3630 = vpow2.f32 %v2389_v1  ;;  %v2387_v4 = vmul.f32 1.442695, %v2385_v3  ;;  %v3107_v1 = vld [vmem:[%s4368_s11 + $0x1] ss:$0 sm:$0xff] }
0x16e0   :  { %3632 = vpow2.f32 %v2387_v4 }
0x16eb   :  { %v3631_v5 = vpop.eup %3630 }
0x16ec   :  { %v2394_v7 = vsel %vm408_vm4, %v3631_v5, 0.0 }
0x16ed   :  { %v3633_v2 = vpop.eup %3632  ;;  %2395 = vadd.xlane.f32.xlu1 %v2394_v7  ;;  %v3123_v7 = vld [vmem:[%s4369_s14 + $0x78] sm:$0xff] }
0x16ee   :  { %v2391_v10 = vsel %vm408_vm4, %v3633_v2, 0.0 }
0x16ef   :  { %2392 = vadd.xlane.f32.xlu0 %v2391_v10  ;;  %v3121_v10 = vld [vmem:[%s4369_s14 + $0x68] sm:$0xff] }
0x16fe   :  { %2401 = vrot.lane.b32.xlu1 %v4122_v14, %s4408_s4 }
0x1702   :  { %2062 = vrot.lane.b32.xlu1 %v4192_v20, %s4409_s29 }
0x1705   :  { %2403 = vrot.lane.b32.xlu0 %v4120_v12, %s4408_s4 }
0x1706   :  { %2276 = vrot.lane.b32.xlu1 %v2265_v50, %s4410_s3 }
0x1709   :  { %2064 = vrot.lane.b32.xlu0 %v4190_v19, %s4409_s29 }
0x170d   :  { %2278 = vrot.lane.b32.xlu0 %v3474_v49, %s4410_s3  ;;  %v3108_v49 = vld [vmem:[%s4366_s12 + $0x20] sm:$0xff] }
0x1776   :  { %v2396_v11 = vpop.xlane.xlu1 %2395 }
0x1777   :  { %3634 = vrcp.f32 %v2396_v11  ;;  %v3120_v11 = vld [vmem:[%s4369_s14 + $0x60] sm:$0xff] }
0x1778   :  { %v2393_v13 = vpop.xlane.xlu0 %2392 }
0x1779   :  { %3636 = vrcp.f32 %v2393_v13  ;;  %v3119_v13 = vld [vmem:[%s4369_s14 + $0x58] sm:$0xff] }
0x177a   :  { %v2402_v15 = vpop.permute.xlu1 %2401 }
0x177c   :  { %v2404_v16 = vpop.permute.xlu0 %2403 }
0x177d   :  { %3482 = vmatprep.subr.mxu0 %v2404_v16 }
0x177e   :  { %3483 = vmatpush3.msra.mxu0 %v2404_v16  ;;  %v2063_v14 = vpop.permute.xlu1 %2062  ;;  %v3117_v16 = vld [vmem:[%s4369_s14 + $0x48] sm:$0xff] }
0x177f   :  { %2068 = vst.msk [vmem:[#allocation2] sm:$0xff] %vm732_vm5, %v2063_v14  ;;  %3484 = vmatprep.subr.mxu0 %v2402_v15  ;;  %v3116_v14 = vld [vmem:[%s4369_s14 + $0x40] sm:$0xff] }
0x1780   :  { %v2065_v12 = vpop.permute.xlu0 %2064  ;;  %3485 = vmatpush3.msra.mxu0 %v2402_v15  ;;  %v3118_v15 = vld [vmem:[%s4369_s14 + $0x50] sm:$0xff] }
0x1781   :  { %2069 = vst.msk [vmem:[#allocation2 + $0x8] sm:$0xff] %vm732_vm5, %v2065_v12  ;;  %3489 = vmatprep.subr.mxu0 %v3099_v23  ;;  %v3113_v12 = vld [vmem:[%s4370_s13 + $0x1] ss:$0 sm:$0xff] }
0x1782   :  { %v2277_v17 = vpop.permute.xlu1 %2276 }
0x1783   :  { %2282 = vst.msk [vmem:[#allocation2] sm:$0xff] %vm947_vm6, %v2277_v17 }
0x1784   :  { %v2279_v18 = vpop.permute.xlu0 %2278  ;;  %v3635_v19 = vpop.eup %3634 }
0x1785   :  { %2283 = vst.msk [vmem:[#allocation2 + $0x8] sm:$0xff] %vm947_vm6, %v2279_v18  ;;  %v2400_v22 = vmul.f32 %v3635_v19, %v3631_v5 }
0x1786   :  { %v3637_v20 = vpop.eup %3636 }
0x1787   :  { %v2399_v21 = vmul.f32 %v3637_v20, %v3633_v2  ;;  %v3122_v2 = vld [vmem:[%s4369_s14 + $0x70] sm:$0xff] }
0x1789   :  { %3486 = vmatprep.mubr.msk.f32.mxu0 %vm408_vm4, %v2399_v21 }
0x178a   :  { %3487 = vmatmul.mubr.msk.f32.vlgmr.msra.gmra.mxu0 %vm408_vm4, %v2400_v22 }
0x178b   :  { %3490 = vmatpush3.msra.mxu0 %v3099_v23 }
0x178c   :  { %3491 = vmatprep.subr.mxu0 %v3098_v24 }
0x178d   :  { %3492 = vmatpush3.msra.mxu0 %v3098_v24 }
0x178e   :  { %3493 = vmatprep.subr.mxu0 %v3097_v25 }
0x178f   :  { %3494 = vmatpush3.msra.mxu0 %v3097_v25 }
0x1790   :  { %3495 = vmatprep.subr.mxu0 %v3096_v26 }
0x1791   :  { %3496 = vmatpush3.msra.mxu0 %v3096_v26 }
0x1792   :  { %3511 = vmatprep.subr.mxu0 %v3123_v7 }
0x184a   :  { %v3488_v27 = vpop.f32.mrf.mxu0 }
0x184b   :  { %2492 = vrot.lane.b32.xlu0 %v3488_v27, %s4411_s7 }
0x184c   :  { %v2479_v28 = vpop.f32.mrf.mxu0 }
0x184d   :  { %2490 = vrot.lane.b32.xlu1 %v2479_v28, %s4411_s7 }
0x18bd   :  { %v2493_v29 = vpop.permute.xlu0 %2492 }
0x18be   :  { %2497 = vst.msk [vmem:[#allocation2 + $0x8] sm:$0xff] %vm1162_vm7, %v2493_v29 }
0x18bf   :  { %v2491_v30 = vpop.permute.xlu1 %2490 }
0x18c0   :  { %2496 = vst.msk [vmem:[#allocation2] sm:$0xff] %vm1162_vm7, %v2491_v30 }
0x18c5   :  { %v2499_v32 = vld [vmem:[#allocation2 + $0x8] sm:$0xff] }
0x18c7   :  { %v2498_v31 = vld [vmem:[#allocation2] sm:$0xff] }
0x18c8   :  { %3497 = vmatprep.mubr.msk.f32.mxu0 %vm176_vm2, %v2498_v31 }
0x18c9   :  { %3498 = vmatmul.mubr.msk.f32.vlgmr.msra.gmra.mxu0 %vm176_vm2, %v2499_v32 }
0x18ca   :  { %3512 = vmatpush3.msra.mxu0 %v3123_v7 }
0x18cb   :  { %3513 = vmatprep.subr.mxu0 %v3122_v2 }
0x18cc   :  { %3514 = vmatpush3.msra.mxu0 %v3122_v2 }
0x18cd   :  { %3515 = vmatprep.subr.mxu0 %v3121_v10 }
0x18ce   :  { %3516 = vmatpush3.msra.mxu0 %v3121_v10  ;;  %v3131_v10 = vld [vmem:[%s4373_s17 + $0x1] ss:$0 sm:$0xff] }
0x18cf   :  { %3517 = vmatprep.subr.mxu0 %v3120_v11 }
0x18d0   :  { %3518 = vmatpush3.msra.mxu0 %v3120_v11 }
0x18d1   :  { %3519 = vmatprep.subr.mxu0 %v3119_v13 }
0x18d2   :  { %3520 = vmatpush3.msra.mxu0 %v3119_v13 }
0x18d3   :  { %3521 = vmatprep.subr.mxu0 %v3118_v15 }
0x18d4   :  { %3522 = vmatpush3.msra.mxu0 %v3118_v15 }
0x18d5   :  { %3523 = vmatprep.subr.mxu0 %v3117_v16 }
0x18d6   :  { %3524 = vmatpush3.msra.mxu0 %v3117_v16  ;;  %v3132_v16 = vld [vmem:[%s4375_s19] ss:$0 sm:$0xff] }
0x18d7   :  { %3525 = vmatprep.subr.mxu0 %v3116_v14 }
0x18d8   :  { %3526 = vmatpush3.msra.mxu0 %v3116_v14 }
0x1989   :  { %v3499_v34 = vpop.f32.mrf.mxu0 }
0x198a   :  { %v2591_v35 = vadd.f32 %v3499_v34, %v3101_v33 }
0x198b   :  { %v2585_v36 = vpop.f32.mrf.mxu0 }
0x198c   :  { %v2595_v37 = vadd.f32 %v2591_v35, %v4111_v8  ;;  %v2586_v38 = vadd.f32 %v3101_v33, %v2585_v36 }
0x198e   :  { %v2594_v6 = vadd.f32 %v2586_v38, %v4109_v0  ;;  %v2603_v39 = vsel %vm176_vm2, %v2595_v37, 0.0  ;;  %v3111_v0 = vld [vmem:[%s4366_s12 + $0x38] sm:$0xff] }
0x198f   :  { %2604 = vadd.xlane.f32.xlu0 %v2603_v39  ;;  %3500 = vmatprep.subr.mxu1 %v3111_v0 }
0x1990   :  { %v2600_v40 = vsel %vm176_vm2, %v2594_v6, 0.0  ;;  %3501 = vmatpush3.msra.mxu1 %v3111_v0 }
0x1991   :  { %2601 = vadd.xlane.f32.xlu1 %v2600_v40  ;;  %3502 = vmatprep.subr.mxu1 %v3110_v47 }
0x1992   :  { %3503 = vmatpush3.msra.mxu1 %v3110_v47 }
0x1993   :  { %3504 = vmatprep.subr.mxu1 %v3109_v48 }
0x1994   :  { %3505 = vmatpush3.msra.mxu1 %v3109_v48 }
0x1995   :  { %3506 = vmatprep.subr.mxu1 %v3108_v49 }
0x1996   :  { %3507 = vmatpush3.msra.mxu1 %v3108_v49 }
0x1a18   :  { %v2605_v9 = vpop.xlane.xlu0 %2604 }
0x1a19   :  { %v2607_v41 = vmul.f32 0.03125, %v2605_v9 }
0x1a1a   :  { %v2602_v42 = vpop.xlane.xlu1 %2601 }
0x1a1b   :  { %v2609_v61 = vsub.f32 %v2595_v37, %v2607_v41  ;;  %v2606_v59 = vmul.f32 0.03125, %v2602_v42 }
0x1a1d   :  { %v2608_v43 = vsub.f32 %v2594_v6, %v2606_v59  ;;  %v2611_v44 = vmul.f32 %v2609_v61, %v2609_v61  ;;  %v3125_v6 = vld [vmem:[%s4371_s15 + $0x1] ss:$0 sm:$0xff] }
0x1a1f   :  { %v2615_v45 = vsel %vm176_vm2, %v2611_v44, 0.0  ;;  %v2610_v46 = vmul.f32 %v2608_v43, %v2608_v43 }
0x1a20   :  { %2616 = vadd.xlane.f32.xlu1 %v2615_v45 }
0x1a21   :  { %v2612_v8 = vsel %vm176_vm2, %v2610_v46, 0.0 }
0x1a22   :  { %2613 = vadd.xlane.f32.xlu0 %v2612_v8 }
0x1aa9   :  { %v2617_v50 = vpop.xlane.xlu1 %2616 }
0x1aaa   :  { %v2619_v51 = vmul.f32 0.03125, %v2617_v50 }
0x1aab   :  { %v2614_v52 = vpop.xlane.xlu0 %2613 }
0x1aac   :  { %v2621_v53 = vadd.f32 1e-12, %v2619_v51  ;;  %v2618_v54 = vmul.f32 0.03125, %v2614_v52  ;;  %v2903_v52 = vld [vmem:[%s4374_s18 + $0x18] sm:$0xff] }
0x1aad   :  { %3530 = vmatprep.subr.mxu1 %v2903_v52 }
0x1aae   :  { %3638 = vrsqrt.f32 %v2621_v53  ;;  %v2620_v55 = vadd.f32 1e-12, %v2618_v54  ;;  %v2902_v53 = vld [vmem:[%s4374_s18 + $0x10] sm:$0xff]  ;;  %v2901_v54 = vld [vmem:[%s4374_s18 + $0x8] sm:$0xff] }
0x1ab0   :  { %3640 = vrsqrt.f32 %v2620_v55  ;;  %v2900_v55 = vld [vmem:[%s4374_s18] sm:$0xff] }
0x1abb   :  { %v3639_v56 = vpop.eup %3638 }
0x1abc   :  { %v2625_v58 = vmul.f32 %v3639_v56, %v2609_v61 }
0x1abd   :  { %v3641_v60 = vpop.eup %3640 }
0x1abe   :  { %v2624_v62 = vmul.f32 %v3641_v60, %v2608_v43  ;;  %v2633_v63 = vmul.f32 %v3106_v57, %v2625_v58 }
0x1ac0   :  { %v2632_v3 = vmul.f32 %v3106_v57, %v2624_v62  ;;  %v2641_v5 = vadd.f32 %v3107_v1, %v2633_v63 }
0x1ac2   :  { %v2640_v4 = vadd.f32 %v3107_v1, %v2632_v3  ;;  %v3130_v3 = vld [vmem:[%s4372_s16 + $0x1] ss:$0 sm:$0xff] }
0x1ac4   :  { %3508 = vmatprep.mubr.msk.f32.mxu1 %vm176_vm2, %v2640_v4 }
0x1ac5   :  { %3509 = vmatmul.mubr.msk.f32.vlgmr.msra.gmra.mxu1 %vm176_vm2, %v2641_v5 }
0x1ac6   :  { %3531 = vmatpush3.msra.mxu1 %v2903_v52 }
0x1ac7   :  { %3532 = vmatprep.subr.mxu1 %v2902_v53 }
0x1ac8   :  { %3533 = vmatpush3.msra.mxu1 %v2902_v53 }
0x1ac9   :  { %3534 = vmatprep.subr.mxu1 %v2901_v54 }
0x1aca   :  { %3535 = vmatpush3.msra.mxu1 %v2901_v54 }
0x1acb   :  { %3536 = vmatprep.subr.mxu1 %v2900_v55 }
0x1acc   :  { %3537 = vmatpush3.msra.mxu1 %v2900_v55 }
0x1b85   :  { %v3510_v17 = vpop.f32.mrf.mxu1 }
0x1b86   :  { %v2733_v18 = vadd.f32 %v3510_v17, %v3113_v12 }
0x1b87   :  { %v2727_v19 = vpop.f32.mrf.mxu1 }
0x1b88   :  { %v2739_v20 = vmul.f32 0.044715, %v2733_v18  ;;  %v2728_v21 = vadd.f32 %v3113_v12, %v2727_v19  ;;  %v2737_v36 = vmul.f32 0.5, %v2733_v18 }
0x1b8a   :  { %v2741_v22 = vmul.f32 %v2739_v20, %v2733_v18  ;;  %v2738_v23 = vmul.f32 0.044715, %v2728_v21  ;;  %v2736_v34 = vmul.f32 0.5, %v2728_v21 }
0x1b8c   :  { %v2743_v24 = vmul.f32 %v2741_v22, %v2733_v18  ;;  %v2740_v25 = vmul.f32 %v2738_v23, %v2728_v21 }
0x1b8e   :  { %v2745_v26 = vadd.f32 %v2743_v24, %v2733_v18  ;;  %v2742_v27 = vmul.f32 %v2740_v25, %v2728_v21 }
0x1b90   :  { %v2747_v28 = vmul.f32 0.7978846, %v2745_v26  ;;  %v2744_v29 = vadd.f32 %v2742_v27, %v2728_v21 }
0x1b92   :  { %3642 = vtanh.f32 %v2747_v28  ;;  %v2746_v30 = vmul.f32 0.7978846, %v2744_v29 }
0x1b94   :  { %3644 = vtanh.f32 %v2746_v30 }
0x1b9f   :  { %v3643_v31 = vpop.eup %3642 }
0x1ba0   :  { %v2751_v33 = vadd.f32 1.0, %v3643_v31 }
0x1ba1   :  { %v3645_v32 = vpop.eup %3644 }
0x1ba2   :  { %v2750_v35 = vadd.f32 1.0, %v3645_v32  ;;  %v2753_v38 = vmul.f32 %v2751_v33, %v2737_v36 }
0x1ba4   :  { %v2752_v37 = vmul.f32 %v2750_v35, %v2736_v34 }
0x1ba6   :  { %3527 = vmatprep.mubr.msk.f32.mxu0 %vm1430_vm8, %v2752_v37 }
0x1ba7   :  { %3528 = vmatmul.mubr.msk.f32.vlgmr.msra.gmra.mxu0 %vm1430_vm8, %v2753_v38 }
0x1c67   :  { %v3529_v39 = vpop.f32.mrf.mxu0 }
0x1c68   :  { %v2849_v40 = vadd.f32 %v3529_v39, %v3125_v6 }
0x1c69   :  { %v2843_v9 = vpop.f32.mrf.mxu0 }
0x1c6a   :  { %v2853_v41 = vadd.f32 %v2849_v40, %v2641_v5  ;;  %v2844_v42 = vadd.f32 %v3125_v6, %v2843_v9 }
0x1c6c   :  { %v2852_v61 = vadd.f32 %v2844_v42, %v2640_v4  ;;  %v2861_v59 = vsel %vm176_vm2, %v2853_v41, 0.0 }
0x1c6d   :  { %2862 = vadd.xlane.f32.xlu1 %v2861_v59 }
0x1c6e   :  { %v2858_v43 = vsel %vm176_vm2, %v2852_v61, 0.0 }
0x1c6f   :  { %2859 = vadd.xlane.f32.xlu0 %v2858_v43 }
0x1cf6   :  { %v2863_v44 = vpop.xlane.xlu1 %2862 }
0x1cf7   :  { %v2865_v45 = vmul.f32 0.03125, %v2863_v44 }
0x1cf8   :  { %v2860_v46 = vpop.xlane.xlu0 %2859 }
0x1cf9   :  { %v2867_v8 = vsub.f32 %v2853_v41, %v2865_v45  ;;  %v2864_v0 = vmul.f32 0.03125, %v2860_v46 }
0x1cfb   :  { %v2866_v47 = vsub.f32 %v2852_v61, %v2864_v0  ;;  %v2869_v48 = vmul.f32 %v2867_v8, %v2867_v8 }
0x1cfd   :  { %v2873_v49 = vsel %vm176_vm2, %v2869_v48, 0.0  ;;  %v2868_v50 = vmul.f32 %v2866_v47, %v2866_v47 }
0x1cfe   :  { %2874 = vadd.xlane.f32.xlu1 %v2873_v49 }
0x1cff   :  { %v2870_v51 = vsel %vm176_vm2, %v2868_v50, 0.0 }
0x1d00   :  { %2871 = vadd.xlane.f32.xlu0 %v2870_v51 }
0x1d87   :  { %v2875_v56 = vpop.xlane.xlu1 %2874 }
0x1d88   :  { %v2877_v57 = vmul.f32 0.03125, %v2875_v56 }
0x1d89   :  { %v2872_v58 = vpop.xlane.xlu0 %2871 }
0x1d8a   :  { %v2879_v60 = vadd.f32 1e-12, %v2877_v57  ;;  %v2876_v62 = vmul.f32 0.03125, %v2872_v58 }
0x1d8c   :  { %3646 = vrsqrt.f32 %v2879_v60  ;;  %v2878_v63 = vadd.f32 1e-12, %v2876_v62 }
0x1d8e   :  { %3648 = vrsqrt.f32 %v2878_v63 }
0x1d99   :  { %v3647_v1 = vpop.eup %3646 }
0x1d9a   :  { %v2883_v4 = vmul.f32 %v3647_v1, %v2867_v8 }
0x1d9b   :  { %v3649_v5 = vpop.eup %3648 }
0x1d9c   :  { %v2882_v7 = vmul.f32 %v3649_v5, %v2866_v47  ;;  %v2891_v2 = vmul.f32 %v3130_v3, %v2883_v4 }
0x1d9e   :  { %v2890_v11 = vmul.f32 %v3130_v3, %v2882_v7  ;;  %v2899_v15 = vadd.f32 %v3131_v10, %v2891_v2 }
0x1da0   :  { %v2898_v13 = vadd.f32 %v3131_v10, %v2890_v11 }
0x1da2   :  { %3538 = vmatprep.mubr.msk.f32.mxu1 %vm176_vm2, %v2898_v13 }
0x1da3   :  { %3539 = vmatmul.mubr.msk.f32.vlgmr.msra.gmra.mxu1 %vm176_vm2, %v2899_v15 }
0x1e63   :  { %v3540_v14 = vpop.f32.mrf.mxu1 }
0x1e64   :  { %v2989_v12 = vadd.f32 %v3540_v14, %v3132_v16 }
0x1e65   :  { %v2983_v17 = vpop.f32.mrf.mxu1 }
0x1e66   :  { %v2984_v18 = vadd.f32 %v3132_v16, %v2983_v17  ;;  %2994 = vmax.xlane.f32.xlu1 %v2989_v12 }
0x1e68   :  { %2992 = vmax.xlane.f32.xlu0 %v2984_v18 }
0x1eef   :  { %v2995_v19 = vpop.xlane.xlu1 %2994 }
0x1ef0   :  { %v2997_v20 = vsub.f32 %v2989_v12, %v2995_v19 }
0x1ef1   :  { %v2993_v21 = vpop.xlane.xlu0 %2992 }
0x1ef2   :  { %v3000_v22 = vmul.f32 1.442695, %v2997_v20  ;;  %v2996_v23 = vsub.f32 %v2984_v18, %v2993_v21 }
0x1ef4   :  { %3650 = vpow2.f32 %v3000_v22  ;;  %v2998_v24 = vmul.f32 1.442695, %v2996_v23 }
0x1ef6   :  { %3652 = vpow2.f32 %v2998_v24 }
0x1f01   :  { %v3651_v25 = vpop.eup %3650 }
0x1f02   :  { %3004 = vadd.xlane.f32.xlu1 %v3651_v25 }
0x1f03   :  { %v3653_v26 = vpop.eup %3652 }
0x1f04   :  { %3002 = vadd.xlane.f32.xlu0 %v3653_v26 }
0x1f8b   :  { %v3005_v27 = vpop.xlane.xlu1 %3004 }
0x1f8c   :  { %3654 = vlog2.f32 %v3005_v27 }
0x1f8d   :  { %v3003_v28 = vpop.xlane.xlu0 %3002 }
0x1f8e   :  { %3656 = vlog2.f32 %v3003_v28 }
0x1f99   :  { %v3655_v29 = vpop.eup %3654 }
0x1f9a   :  { %v3009_v30 = vmul.f32 0.6931472, %v3655_v29 }
0x1f9b   :  { %v3657_v31 = vpop.eup %3656 }
0x1f9c   :  { %v3011_v32 = vsub.f32 %v2997_v20, %v3009_v30  ;;  %v3007_v33 = vmul.f32 0.6931472, %v3657_v31 }
0x1f9e   :  { %3013 = vst [vmem:[%s4376_s20 + $0x8] sm:$0xff] %v3011_v32  ;;  %v3010_v34 = vsub.f32 %v2996_v23, %v3007_v33 }
0x1fa0   :  { %3012 = vst [vmem:[%s4376_s20] sm:$0xff] %v3010_v34 }

</bundles_post_ra>
